<compile_context>
chip_gen: v6e
topology: v6e:2x2x1
jax: 0.10.0
libtpu: 0.0.40
codegen_flags: <defaults>
</compile_context>

<pallas_src>
import functools
import math

import jax
import jax.numpy as jnp
from jax.experimental import pallas as pl
from jax.experimental.pallas import tpu as pltpu


# ----------------------------- in-kernel math helpers -----------------------------

def _layer_norm(x, gamma, beta, eps=1e-5):
    mu = jnp.mean(x, axis=-1, keepdims=True)
    var = jnp.mean((x - mu) ** 2, axis=-1, keepdims=True)
    return (x - mu) * jax.lax.rsqrt(var + eps) * gamma + beta


_BMM = (((2,), (1,)), ((0,), (0,)))    # batched (h, m, k) @ (h, k, n) -> (h, m, n)
_BQKT = (((2,), (2,)), ((0,), (0,)))   # batched (h, t, d) @ (h, s, d)^T -> (h, t, s)


def _mha(x_q, x_kv, mask, wq_h, bq_h, wk_h, bk_h, wv_h, bv_h, wo_h, bo, num_heads):
    """Head-batched multi-head attention on a single sequence.

    x_q: (T, D) f32, x_kv: (S, D) f32, mask: (T, S) with 0 => masked.
    wq_h/wk_h/wv_h: (H, D, dh) bf16, bq_h/bk_h/bv_h: (H, 1, dh) f32,
    wo_h: (H, dh, D) bf16, bo: (1, D) f32.
    The 1/sqrt(dh) scale is pre-folded into wq_h / bq_h (wrapper-side).
    """
    H = num_heads
    T, D = x_q.shape
    S = x_kv.shape[0]

    xq = jnp.broadcast_to(x_q.astype(jnp.bfloat16)[None], (H, T, D))
    xkv = xq if x_kv is x_q else jnp.broadcast_to(x_kv.astype(jnp.bfloat16)[None], (H, S, D))

    q = jax.lax.dot_general(xq, wq_h, _BMM, preferred_element_type=jnp.float32) + bq_h   # (H,T,dh)
    k = jax.lax.dot_general(xkv, wk_h, _BMM, preferred_element_type=jnp.float32) + bk_h  # (H,S,dh)
    v = jax.lax.dot_general(xkv, wv_h, _BMM, preferred_element_type=jnp.float32) + bv_h  # (H,S,dh)

    # scores for all heads in one batched matmul
    s = jax.lax.dot_general(q.astype(jnp.bfloat16), k.astype(jnp.bfloat16), _BQKT,
                            preferred_element_type=jnp.float32)                          # (H,T,S)
    s = jnp.where(mask[None, :, :] == 0.0, -1e9, s)          # single compare, shared by all heads
    s_max = jnp.max(s, axis=-1, keepdims=True)
    p = jnp.exp(s - s_max)
    p = p * pl.reciprocal(jnp.sum(p, axis=-1, keepdims=True), approx=True)

    o = jax.lax.dot_general(p.astype(jnp.bfloat16), v.astype(jnp.bfloat16), _BMM,
                            preferred_element_type=jnp.float32)                          # (H,T,dh)
    # concat(heads) @ Wo  ==  sum_h o_h @ Wo_h  (one head-batched matmul + reduce over heads)
    out_h = jax.lax.dot_general(o.astype(jnp.bfloat16), wo_h, _BMM,
                                preferred_element_type=jnp.float32)                      # (H,T,D)
    return jnp.sum(out_h, axis=0) + bo


def _ffn(x, w1, b1, w2, b2):
    h = jnp.dot(x.astype(jnp.bfloat16), w1, preferred_element_type=jnp.float32) + b1
    h = jnp.maximum(h, 0.0)
    return jnp.dot(h.astype(jnp.bfloat16), w2, preferred_element_type=jnp.float32) + b2


# ----------------------------- fused decoder kernel -----------------------------

def decoder_kernel(x_ref, enc_ref, tmask_ref, smask_ref, *rest, num_heads):
    (sa_wq, sa_bq, sa_wk, sa_bk, sa_wv, sa_bv, sa_wo, sa_bo,
     ca_wq, ca_bq, ca_wk, ca_bk, ca_wv, ca_bv, ca_wo, ca_bo,
     w1, b1, w2, b2,
     g1, be1, g2, be2, g3, be3,
     gf, bef,
     out_ref, x_scr) = rest

    layer = pl.program_id(1)

    @pl.when(layer == 0)
    def _():
        x_scr[...] = x_ref[0]

    x = x_scr[...]            # (T, D) f32, resident in VMEM across the layer axis
    enc = enc_ref[0]          # (S, D)
    tmask = tmask_ref[0]      # (T, T)
    smask = smask_ref[0]      # (T, S)

    # self-attention + residual + LayerNorm  (dropout == identity)
    sa = _mha(x, x, tmask,
              sa_wq[0], sa_bq[0], sa_wk[0], sa_bk[0],
              sa_wv[0], sa_bv[0], sa_wo[0], sa_bo[0], num_heads)
    x = _layer_norm(x + sa, g1[0], be1[0])

    # cross-attention + residual + LayerNorm
    ca = _mha(x, enc, smask,
              ca_wq[0], ca_bq[0], ca_wk[0], ca_bk[0],
              ca_wv[0], ca_bv[0], ca_wo[0], ca_bo[0], num_heads)
    x = _layer_norm(x + ca, g2[0], be2[0])

    # position-wise feed-forward + residual + LayerNorm
    ff = _ffn(x, w1[0], b1[0], w2[0], b2[0])
    x = _layer_norm(x + ff, g3[0], be3[0])

    x_scr[...] = x

    @pl.when(layer == pl.num_programs(1) - 1)
    def _():
        # final Decoder LayerNorm, fused into the last layer iteration
        out_ref[0] = _layer_norm(x, gf[...], bef[...])


# ----------------------------- wrapper (weight repack + pallas_call plumbing) -----------------------------

def _prepare_weights(params, num_heads):
    """Repack PyTorch-layout f32 params into the kernel layout:
       Q/K/V weights split per head -> (H, D, dh), biases -> (H, 1, dh), Wo -> (H, dh, D);
       1/sqrt(dh) folded into Wq/bq; matmul weights cast to bf16 (biases / LN params stay f32);
       everything stacked along a leading layer axis."""
    H = num_heads
    per_layer = []
    for fw in params["layers"]:
        (sa_wq, sa_bq, sa_wk, sa_bk, sa_wv, sa_bv, sa_wo, sa_bo,
         ca_wq, ca_bq, ca_wk, ca_bk, ca_wv, ca_bv, ca_wo, ca_bo,
         w1, b1, w2, b2, g1, be1, g2, be2, g3, be3) = fw
        D = sa_wq.shape[0]
        dh = D // H
        scale = 1.0 / math.sqrt(dh)

        def split_w(w):                       # (D, D) -> (H, D, dh)
            return w.reshape(D, H, dh).transpose(1, 0, 2).astype(jnp.bfloat16)

        def split_b(b):                       # (1, D) -> (H, 1, dh)
            return b.reshape(H, dh)[:, None, :].astype(jnp.float32)

        def split_wo(w):                      # (D, D) -> (H, dh, D)
            return w.reshape(H, dh, w.shape[1]).astype(jnp.bfloat16)

        per_layer.append([
            split_w(sa_wq * scale), split_b(sa_bq * scale),
            split_w(sa_wk), split_b(sa_bk),
            split_w(sa_wv), split_b(sa_bv),
            split_wo(sa_wo), sa_bo,
            split_w(ca_wq * scale), split_b(ca_bq * scale),
            split_w(ca_wk), split_b(ca_bk),
            split_w(ca_wv), split_b(ca_bv),
            split_wo(ca_wo), ca_bo,
            w1.astype(jnp.bfloat16), b1,
            w2.astype(jnp.bfloat16), b2,
            g1, be1, g2, be2, g3, be3,
        ])
    n = len(per_layer[0])
    stacked = [jnp.stack([layer[i] for layer in per_layer], axis=0) for i in range(n)]
    gf, bef = params["final_norm"]
    return stacked, gf, bef


def decoder_forward(x, enc_output, src_mask, tgt_mask, params, num_heads):
    """Matches Decoder.forward(x, enc_output, src_mask, tgt_mask) in eval mode."""
    B, T, D = x.shape
    S = enc_output.shape[1]
    L = len(params["layers"])
    d_ff = params["layers"][0][16].shape[1]
    H = num_heads

    stacked, gf, bef = _prepare_weights(params, num_heads)

    # 0/1 masks are exact in bf16; halves mask DMA traffic.
    # TODO(synk): at realistic T/S the masks should not be shipped at all — build the causal
    # tgt_mask in-kernel from broadcasted_iota and pass src padding as per-batch lengths via
    # PrefetchScalarGridSpec (kept as tensor inputs here to preserve the module's arbitrary-mask API).
    tmask = tgt_mask.astype(jnp.bfloat16)
    smask = src_mask.astype(jnp.bfloat16)

    def _layer_spec(arr):
        rest = arr.shape[1:]
        zeros = (0,) * len(rest)
        return pl.BlockSpec((1,) + rest, lambda b, l, _z=zeros: (l,) + _z)

    in_specs = [
        pl.BlockSpec((1, T, D), lambda b, l: (b, 0, 0)),
        pl.BlockSpec((1, S, D), lambda b, l: (b, 0, 0)),
        pl.BlockSpec((1, T, T), lambda b, l: (b, 0, 0)),
        pl.BlockSpec((1, T, S), lambda b, l: (b, 0, 0)),
    ] + [_layer_spec(w) for w in stacked] + [
        pl.BlockSpec((1, D), lambda b, l: (0, 0)),
        pl.BlockSpec((1, D), lambda b, l: (0, 0)),
    ]
    # TODO(synk): with d_model < 128 the (1, T, D) output store is lane-masked; for realistic
    # d_model >= 128 it becomes lane-dense automatically.
    out_specs = pl.BlockSpec((1, T, D), lambda b, l: (b, 0, 0))

    # ---- explicit VMEM budget: double-buffered blocks + resident scratch, clamped to safe range ----
    per_layer_w_bytes = sum(int(a.size) * a.dtype.itemsize for a in stacked) // L
    act_block_bytes = (2 * T * D + S * D) * 4 + (T * T + T * S) * 2 + 2 * D * 4
    vmem_needed = 2 * (per_layer_w_bytes + act_block_bytes) + T * D * 4
    vmem_limit = int(min(max(vmem_needed + (4 << 20), 16 << 20), 96 << 20))

    # ---- advisory cost estimate for the XLA scheduler ----
    flops_per_step = (8 * T * D * D + 4 * T * T * D                     # self-attention
                      + 4 * T * D * D + 4 * S * D * D + 4 * T * S * D   # cross-attention
                      + 4 * T * D * d_ff)                               # feed-forward
    flops = int(B * L * flops_per_step)
    transcendentals = int(B * L * H * (T * T + T * S))
    bytes_accessed = int(sum(int(a.size) * a.dtype.itemsize
                             for a in [x, enc_output, tmask, smask, gf, bef] + stacked)
                         + B * T * D * 4)

    kernel = functools.partial(decoder_kernel, num_heads=num_heads)
    return pl.pallas_call(
        kernel,
        out_shape=jax.ShapeDtypeStruct((B, T, D), jnp.float32),
        grid=(B, L),
        in_specs=in_specs,
        out_specs=out_specs,
        scratch_shapes=[pltpu.VMEM((T, D), jnp.float32)],
        compiler_params=pltpu.CompilerParams(
            dimension_semantics=("parallel", "arbitrary"),
            vmem_limit_bytes=vmem_limit),
        cost_estimate=pl.CostEstimate(flops=flops,
                                      transcendentals=transcendentals,
                                      bytes_accessed=bytes_accessed),
    )(x, enc_output, tmask, smask, *stacked, gf, bef)


# ----------------------------- deterministic parameter init -----------------------------

def init_params(key, num_layers, d_model, num_heads, d_ff):
    keys = iter(jax.random.split(key, 20 * num_layers + 2))

    def linear(din, dout):
        w = 0.05 * jax.random.normal(next(keys), (din, dout), jnp.float32)
        b = 0.05 * jax.random.normal(next(keys), (1, dout), jnp.float32)
        return w, b

    layers = []
    for _ in range(num_layers):
        flat = []
        for _ in range(2):                      # self-attn, then cross-attn
            for _ in range(4):                  # Wq, Wk, Wv, Wo
                w, b = linear(d_model, d_model)
                flat += [w, b]
        w1, b1 = linear(d_model, d_ff)
        flat += [w1, b1]
        w2, b2 = linear(d_ff, d_model)
        flat += [w2, b2]
        for _ in range(3):                      # norm1, norm2, norm3 (gamma=1, beta=0)
            flat += [jnp.ones((1, d_model), jnp.float32),
                     jnp.zeros((1, d_model), jnp.float32)]
        layers.append(flat)

    final_norm = (jnp.ones((1, d_model), jnp.float32), jnp.zeros((1, d_model), jnp.float32))
    return {"layers": layers, "final_norm": final_norm}


# ----------------------------- pure-JAX f32 reference (correctness check) -----------------------------

def _ref_mha(x_q, x_kv, mask, wq, bq, wk, bk, wv, bv, wo, bo, H):
    B, T, D = x_q.shape
    S = x_kv.shape[1]
    dh = D // H
    q = (x_q @ wq + bq).reshape(B, T, H, dh).transpose(0, 2, 1, 3)
    k = (x_kv @ wk + bk).reshape(B, S, H, dh).transpose(0, 2, 1, 3)
    v = (x_kv @ wv + bv).reshape(B, S, H, dh).transpose(0, 2, 1, 3)
    s = jnp.einsum('bhtd,bhsd->bhts', q, k) / math.sqrt(dh)
    s = jnp.where(mask[:, None] == 0.0, -1e9, s)
    p = jax.nn.softmax(s, axis=-1)
    o = jnp.einsum('bhts,bhsd->bhtd', p, v).transpose(0, 2, 1, 3).reshape(B, T, D)
    return o @ wo + bo


def _ref_ln(x, gamma, beta, eps=1e-5):
    mu = jnp.mean(x, axis=-1, keepdims=True)
    var = jnp.mean((x - mu) ** 2, axis=-1, keepdims=True)
    return (x - mu) * jax.lax.rsqrt(var + eps) * gamma + beta


def ref_decoder(x, enc, src_mask, tgt_mask, params, num_heads):
    for fw in params["layers"]:
        (sa_wq, sa_bq, sa_wk, sa_bk, sa_wv, sa_bv, sa_wo, sa_bo,
         ca_wq, ca_bq, ca_wk, ca_bk, ca_wv, ca_bv, ca_wo, ca_bo,
         w1, b1, w2, b2, g1, be1, g2, be2, g3, be3) = fw
        sa = _ref_mha(x, x, tgt_mask, sa_wq, sa_bq, sa_wk, sa_bk, sa_wv, sa_bv,
                      sa_wo, sa_bo, num_heads)
        x = _ref_ln(x + sa, g1, be1)
        ca = _ref_mha(x, enc, src_mask, ca_wq, ca_bq, ca_wk, ca_bk, ca_wv, ca_bv,
                      ca_wo, ca_bo, num_heads)
        x = _ref_ln(x + ca, g2, be2)
        ff = jnp.maximum(x @ w1 + b1, 0.0) @ w2 + b2
        x = _ref_ln(x + ff, g3, be3)
    g, b = params["final_norm"]
    return _ref_ln(x, g, b)


# ----------------------------- main -----------------------------

if __name__ == "__main__":
    # TODO(synk): dropout layers are treated as identity (eval mode); no RNG dropout in-kernel.
    num_layers, d_model, num_heads, d_ff = 2, 32, 4, 64
    B, T, S = 2, 8, 8

    key = jax.random.PRNGKey(0)
    k_x, k_enc, k_p = jax.random.split(key, 3)
    x = jax.random.normal(k_x, (B, T, d_model), jnp.float32)
    enc_output = jax.random.normal(k_enc, (B, S, d_model), jnp.float32)

    # causal target mask (B, T, T); source padding mask (B, T, S) with last 2 positions of batch 1 masked
    tgt_mask = jnp.tile(jnp.tril(jnp.ones((T, T), jnp.float32))[None], (B, 1, 1))
    src_mask = jnp.ones((B, T, S), jnp.float32).at[1, :, S - 2:].set(0.0)

    params = init_params(k_p, num_layers, d_model, num_heads, d_ff)

    out = decoder_forward(x, enc_output, src_mask, tgt_mask, params, num_heads)
    out = jax.block_until_ready(out)

    ref = ref_decoder(x, enc_output, src_mask, tgt_mask, params, num_heads)
    assert out.shape == (B, T, d_model)
    max_err = float(jnp.max(jnp.abs(out - ref)))
    # tolerance reflects bf16 MXU matmuls + approx-reciprocal softmax vs the f32 reference
    assert max_err < 5e-2, f"max abs err = {max_err}"

    print("KERNEL_OK")
</pallas_src>

<mosaic_0001>
module attributes {stable_mosaic.version = 11 : i64} {
  func.func @decoder_kernel(%arg0: i32, %arg1: i32, %arg2: memref<1x8x32xf32, #tpu.memory_space<vmem>>, %arg3: memref<1x8x32xf32, #tpu.memory_space<vmem>>, %arg4: memref<1x8x8xbf16, #tpu.memory_space<vmem>>, %arg5: memref<1x8x8xbf16, #tpu.memory_space<vmem>>, %arg6: memref<1x4x32x8xbf16, #tpu.memory_space<vmem>>, %arg7: memref<1x4x1x8xf32, #tpu.memory_space<vmem>>, %arg8: memref<1x4x32x8xbf16, #tpu.memory_space<vmem>>, %arg9: memref<1x4x1x8xf32, #tpu.memory_space<vmem>>, %arg10: memref<1x4x32x8xbf16, #tpu.memory_space<vmem>>, %arg11: memref<1x4x1x8xf32, #tpu.memory_space<vmem>>, %arg12: memref<1x4x8x32xbf16, #tpu.memory_space<vmem>>, %arg13: memref<1x1x32xf32, #tpu.memory_space<vmem>>, %arg14: memref<1x4x32x8xbf16, #tpu.memory_space<vmem>>, %arg15: memref<1x4x1x8xf32, #tpu.memory_space<vmem>>, %arg16: memref<1x4x32x8xbf16, #tpu.memory_space<vmem>>, %arg17: memref<1x4x1x8xf32, #tpu.memory_space<vmem>>, %arg18: memref<1x4x32x8xbf16, #tpu.memory_space<vmem>>, %arg19: memref<1x4x1x8xf32, #tpu.memory_space<vmem>>, %arg20: memref<1x4x8x32xbf16, #tpu.memory_space<vmem>>, %arg21: memref<1x1x32xf32, #tpu.memory_space<vmem>>, %arg22: memref<1x32x64xbf16, #tpu.memory_space<vmem>>, %arg23: memref<1x1x64xf32, #tpu.memory_space<vmem>>, %arg24: memref<1x64x32xbf16, #tpu.memory_space<vmem>>, %arg25: memref<1x1x32xf32, #tpu.memory_space<vmem>>, %arg26: memref<1x1x32xf32, #tpu.memory_space<vmem>>, %arg27: memref<1x1x32xf32, #tpu.memory_space<vmem>>, %arg28: memref<1x1x32xf32, #tpu.memory_space<vmem>>, %arg29: memref<1x1x32xf32, #tpu.memory_space<vmem>>, %arg30: memref<1x1x32xf32, #tpu.memory_space<vmem>>, %arg31: memref<1x1x32xf32, #tpu.memory_space<vmem>>, %arg32: memref<1x32xf32, #tpu.memory_space<vmem>>, %arg33: memref<1x32xf32, #tpu.memory_space<vmem>>, %arg34: memref<1x8x32xf32, #tpu.memory_space<vmem>>, %arg35: memref<8x32xf32, #tpu.memory_space<vmem>>) attributes {dimension_semantics = [#tpu.dimension_semantics<parallel>, #tpu.dimension_semantics<arbitrary>], iteration_bounds = array<i64: 2, 2>, scalar_prefetch = 0 : i64, scratch_operands = 1 : i64, tpu.core_type = #tpu.core_type<tc>, window_params = [{transform_indices = @transform_0, window_bounds = array<i64: 1, 8, 32>}, {transform_indices = @transform_1, window_bounds = array<i64: 1, 8, 32>}, {transform_indices = @transform_2, window_bounds = array<i64: 1, 8, 8>}, {transform_indices = @transform_3, window_bounds = array<i64: 1, 8, 8>}, {transform_indices = @transform_4, window_bounds = array<i64: 1, 4, 32, 8>}, {transform_indices = @transform_5, window_bounds = array<i64: 1, 4, 1, 8>}, {transform_indices = @transform_6, window_bounds = array<i64: 1, 4, 32, 8>}, {transform_indices = @transform_7, window_bounds = array<i64: 1, 4, 1, 8>}, {transform_indices = @transform_8, window_bounds = array<i64: 1, 4, 32, 8>}, {transform_indices = @transform_9, window_bounds = array<i64: 1, 4, 1, 8>}, {transform_indices = @transform_10, window_bounds = array<i64: 1, 4, 8, 32>}, {transform_indices = @transform_11, window_bounds = array<i64: 1, 1, 32>}, {transform_indices = @transform_12, window_bounds = array<i64: 1, 4, 32, 8>}, {transform_indices = @transform_13, window_bounds = array<i64: 1, 4, 1, 8>}, {transform_indices = @transform_14, window_bounds = array<i64: 1, 4, 32, 8>}, {transform_indices = @transform_15, window_bounds = array<i64: 1, 4, 1, 8>}, {transform_indices = @transform_16, window_bounds = array<i64: 1, 4, 32, 8>}, {transform_indices = @transform_17, window_bounds = array<i64: 1, 4, 1, 8>}, {transform_indices = @transform_18, window_bounds = array<i64: 1, 4, 8, 32>}, {transform_indices = @transform_19, window_bounds = array<i64: 1, 1, 32>}, {transform_indices = @transform_20, window_bounds = array<i64: 1, 32, 64>}, {transform_indices = @transform_21, window_bounds = array<i64: 1, 1, 64>}, {transform_indices = @transform_22, window_bounds = array<i64: 1, 64, 32>}, {transform_indices = @transform_23, window_bounds = array<i64: 1, 1, 32>}, {transform_indices = @transform_24, window_bounds = array<i64: 1, 1, 32>}, {transform_indices = @transform_25, window_bounds = array<i64: 1, 1, 32>}, {transform_indices = @transform_26, window_bounds = array<i64: 1, 1, 32>}, {transform_indices = @transform_27, window_bounds = array<i64: 1, 1, 32>}, {transform_indices = @transform_28, window_bounds = array<i64: 1, 1, 32>}, {transform_indices = @transform_29, window_bounds = array<i64: 1, 1, 32>}, {pipeline_mode = #tpu.pipeline_mode<synchronous>, transform_indices = @transform_30, window_bounds = array<i64: 1, 32>}, {pipeline_mode = #tpu.pipeline_mode<synchronous>, transform_indices = @transform_31, window_bounds = array<i64: 1, 32>}, {transform_indices = @transform_32, window_bounds = array<i64: 1, 8, 32>}]} {
    %c0_i32 = arith.constant 0 : i32
    %0 = arith.cmpi eq, %arg1, %c0_i32 : i32
    %1 = arith.extui %0 : i1 to i32
    %c0_i32_0 = arith.constant 0 : i32
    %2 = arith.cmpi ne, %1, %c0_i32_0 : i32
    scf.if %2 {
      %c0_145 = arith.constant 0 : index
      %c0_146 = arith.constant 0 : index
      %c0_147 = arith.constant 0 : index
      %231 = vector.load %arg2[%c0_145, %c0_146, %c0_147] : memref<1x8x32xf32, #tpu.memory_space<vmem>>, vector<1x8x32xf32>
      %232 = vector.shape_cast %231 : vector<1x8x32xf32> to vector<8x32xf32>
      %c0_148 = arith.constant 0 : index
      %c0_149 = arith.constant 0 : index
      %233 = vector.load %arg35[%c0_148, %c0_149] : memref<8x32xf32, #tpu.memory_space<vmem>>, vector<8x32xf32>
      tpu.vector_store %arg35[%c0_148, %c0_149], %232 {strides = array<i32>} : memref<8x32xf32, #tpu.memory_space<vmem>>, vector<8x32xf32>,
    } else {
    }
    %c0 = arith.constant 0 : index
    %c0_1 = arith.constant 0 : index
    %3 = vector.load %arg35[%c0, %c0_1] : memref<8x32xf32, #tpu.memory_space<vmem>>, vector<8x32xf32>
    %c0_2 = arith.constant 0 : index
    %c0_3 = arith.constant 0 : index
    %c0_4 = arith.constant 0 : index
    %4 = vector.load %arg3[%c0_2, %c0_3, %c0_4] : memref<1x8x32xf32, #tpu.memory_space<vmem>>, vector<1x8x32xf32>
    %5 = vector.shape_cast %4 : vector<1x8x32xf32> to vector<8x32xf32>
    %c0_5 = arith.constant 0 : index
    %c0_6 = arith.constant 0 : index
    %c0_7 = arith.constant 0 : index
    %6 = vector.load %arg4[%c0_5, %c0_6, %c0_7] : memref<1x8x8xbf16, #tpu.memory_space<vmem>>, vector<1x8x8xbf16>
    %7 = vector.shape_cast %6 : vector<1x8x8xbf16> to vector<8x8xbf16>
    %c0_8 = arith.constant 0 : index
    %c0_9 = arith.constant 0 : index
    %c0_10 = arith.constant 0 : index
    %8 = vector.load %arg5[%c0_8, %c0_9, %c0_10] : memref<1x8x8xbf16, #tpu.memory_space<vmem>>, vector<1x8x8xbf16>
    %9 = vector.shape_cast %8 : vector<1x8x8xbf16> to vector<8x8xbf16>
    %c0_11 = arith.constant 0 : index
    %c0_12 = arith.constant 0 : index
    %c0_13 = arith.constant 0 : index
    %c0_14 = arith.constant 0 : index
    %10 = vector.load %arg6[%c0_11, %c0_12, %c0_13, %c0_14] : memref<1x4x32x8xbf16, #tpu.memory_space<vmem>>, vector<1x4x32x8xbf16>
    %11 = vector.shape_cast %10 : vector<1x4x32x8xbf16> to vector<4x32x8xbf16>
    %c0_15 = arith.constant 0 : index
    %c0_16 = arith.constant 0 : index
    %c0_17 = arith.constant 0 : index
    %c0_18 = arith.constant 0 : index
    %12 = vector.load %arg7[%c0_15, %c0_16, %c0_17, %c0_18] : memref<1x4x1x8xf32, #tpu.memory_space<vmem>>, vector<1x4x1x8xf32>
    %13 = vector.shape_cast %12 : vector<1x4x1x8xf32> to vector<4x1x8xf32>
    %c0_19 = arith.constant 0 : index
    %c0_20 = arith.constant 0 : index
    %c0_21 = arith.constant 0 : index
    %c0_22 = arith.constant 0 : index
    %14 = vector.load %arg8[%c0_19, %c0_20, %c0_21, %c0_22] : memref<1x4x32x8xbf16, #tpu.memory_space<vmem>>, vector<1x4x32x8xbf16>
    %15 = vector.shape_cast %14 : vector<1x4x32x8xbf16> to vector<4x32x8xbf16>
    %c0_23 = arith.constant 0 : index
    %c0_24 = arith.constant 0 : index
    %c0_25 = arith.constant 0 : index
    %c0_26 = arith.constant 0 : index
    %16 = vector.load %arg9[%c0_23, %c0_24, %c0_25, %c0_26] : memref<1x4x1x8xf32, #tpu.memory_space<vmem>>, vector<1x4x1x8xf32>
    %17 = vector.shape_cast %16 : vector<1x4x1x8xf32> to vector<4x1x8xf32>
    %c0_27 = arith.constant 0 : index
    %c0_28 = arith.constant 0 : index
    %c0_29 = arith.constant 0 : index
    %c0_30 = arith.constant 0 : index
    %18 = vector.load %arg10[%c0_27, %c0_28, %c0_29, %c0_30] : memref<1x4x32x8xbf16, #tpu.memory_space<vmem>>, vector<1x4x32x8xbf16>
    %19 = vector.shape_cast %18 : vector<1x4x32x8xbf16> to vector<4x32x8xbf16>
    %c0_31 = arith.constant 0 : index
    %c0_32 = arith.constant 0 : index
    %c0_33 = arith.constant 0 : index
    %c0_34 = arith.constant 0 : index
    %20 = vector.load %arg11[%c0_31, %c0_32, %c0_33, %c0_34] : memref<1x4x1x8xf32, #tpu.memory_space<vmem>>, vector<1x4x1x8xf32>
    %21 = vector.shape_cast %20 : vector<1x4x1x8xf32> to vector<4x1x8xf32>
    %c0_35 = arith.constant 0 : index
    %c0_36 = arith.constant 0 : index
    %c0_37 = arith.constant 0 : index
    %c0_38 = arith.constant 0 : index
    %22 = vector.load %arg12[%c0_35, %c0_36, %c0_37, %c0_38] : memref<1x4x8x32xbf16, #tpu.memory_space<vmem>>, vector<1x4x8x32xbf16>
    %23 = vector.shape_cast %22 : vector<1x4x8x32xbf16> to vector<4x8x32xbf16>
    %c0_39 = arith.constant 0 : index
    %c0_40 = arith.constant 0 : index
    %c0_41 = arith.constant 0 : index
    %24 = vector.load %arg13[%c0_39, %c0_40, %c0_41] : memref<1x1x32xf32, #tpu.memory_space<vmem>>, vector<1x1x32xf32>
    %25 = vector.shape_cast %24 : vector<1x1x32xf32> to vector<1x32xf32>
    %26 = arith.truncf %3 : vector<8x32xf32> to vector<8x32xbf16>
    %27 = vector.shape_cast %26 : vector<8x32xbf16> to vector<1x8x32xbf16>
    %28 = vector.shape_cast %27 : vector<1x8x32xbf16> to vector<1x8x32xbf16>
    %29 = vector.broadcast %28 : vector<1x8x32xbf16> to vector<4x8x32xbf16>
    %cst = arith.constant dense<0.000000e+00> : vector<4x8x8xf32>
    %30 = tpu.matmul %29, %11, %cst {dimension_numbers = #tpu.dot_dimension_numbers<[2], [1], [1], [2], [0, 0, 0, 1, 1, 2], [0], [0]>} : vector<4x8x32xbf16>, vector<4x32x8xbf16>, vector<4x8x8xf32> -> vector<4x8x8xf32>
    %31 = vector.broadcast %13 : vector<4x1x8xf32> to vector<4x8x8xf32>
    %32 = arith.addf %30, %31 : vector<4x8x8xf32>
    %cst_42 = arith.constant dense<0.000000e+00> : vector<4x8x8xf32>
    %33 = tpu.matmul %29, %15, %cst_42 {dimension_numbers = #tpu.dot_dimension_numbers<[2], [1], [1], [2], [0, 0, 0, 1, 1, 2], [0], [0]>} : vector<4x8x32xbf16>, vector<4x32x8xbf16>, vector<4x8x8xf32> -> vector<4x8x8xf32>
    %34 = vector.broadcast %17 : vector<4x1x8xf32> to vector<4x8x8xf32>
    %35 = arith.addf %33, %34 : vector<4x8x8xf32>
    %cst_43 = arith.constant dense<0.000000e+00> : vector<4x8x8xf32>
    %36 = tpu.matmul %29, %19, %cst_43 {dimension_numbers = #tpu.dot_dimension_numbers<[2], [1], [1], [2], [0, 0, 0, 1, 1, 2], [0], [0]>} : vector<4x8x32xbf16>, vector<4x32x8xbf16>, vector<4x8x8xf32> -> vector<4x8x8xf32>
    %37 = vector.broadcast %21 : vector<4x1x8xf32> to vector<4x8x8xf32>
    %38 = arith.addf %36, %37 : vector<4x8x8xf32>
    %39 = arith.truncf %32 : vector<4x8x8xf32> to vector<4x8x8xbf16>
    %40 = arith.truncf %35 : vector<4x8x8xf32> to vector<4x8x8xbf16>
    %cst_44 = arith.constant dense<0.000000e+00> : vector<4x8x8xf32>
    %41 = tpu.matmul %39, %40, %cst_44 {dimension_numbers = #tpu.dot_dimension_numbers<[2], [2], [1], [1], [0, 0, 0, 1, 1, 1], [0], [0]>} : vector<4x8x8xbf16>, vector<4x8x8xbf16>, vector<4x8x8xf32> -> vector<4x8x8xf32>
    %42 = vector.shape_cast %7 : vector<8x8xbf16> to vector<1x8x8xbf16>
    %cst_45 = arith.constant 0.000000e+00 : bf16
    %43 = vector.broadcast %cst_45 : bf16 to vector<1x8x8xbf16>
    %44 = arith.cmpf oeq, %42, %43 : vector<1x8x8xbf16>
    %cst_46 = arith.constant -1.000000e+09 : f32
    %45 = vector.shape_cast %44 : vector<1x8x8xi1> to vector<1x8x8xi1>
    %46 = vector.broadcast %45 : vector<1x8x8xi1> to vector<4x8x8xi1>
    %47 = vector.broadcast %cst_46 : f32 to vector<4x8x8xf32>
    %48 = arith.select %46, %47, %41 : vector<4x8x8xi1>, vector<4x8x8xf32>
    %cst_47 = arith.constant dense<0xFF800000> : vector<4x8xf32>
    %49 = vector.multi_reduction <maximumf>, %48, %cst_47 [2] : vector<4x8x8xf32> to vector<4x8xf32>
    %50 = vector.shape_cast %49 : vector<4x8xf32> to vector<4x8x1xf32>
    %51 = vector.broadcast %50 : vector<4x8x1xf32> to vector<4x8x8xf32>
    %52 = arith.subf %48, %51 : vector<4x8x8xf32>
    %53 = math.exp %52 : vector<4x8x8xf32>
    %cst_48 = arith.constant dense<0.000000e+00> : vector<4x8xf32>
    %54 = vector.multi_reduction <add>, %53, %cst_48 [2] : vector<4x8x8xf32> to vector<4x8xf32>
    %55 = vector.shape_cast %54 : vector<4x8xf32> to vector<4x8x1xf32>
    %56 = tpu.reciprocal %55 {approx = true} : vector<4x8x1xf32> -> vector<4x8x1xf32>
    %57 = vector.broadcast %56 : vector<4x8x1xf32> to vector<4x8x8xf32>
    %58 = arith.mulf %53, %57 : vector<4x8x8xf32>
    %59 = arith.truncf %58 : vector<4x8x8xf32> to vector<4x8x8xbf16>
    %60 = arith.truncf %38 : vector<4x8x8xf32> to vector<4x8x8xbf16>
    %cst_49 = arith.constant dense<0.000000e+00> : vector<4x8x8xf32>
    %61 = tpu.matmul %59, %60, %cst_49 {dimension_numbers = #tpu.dot_dimension_numbers<[2], [1], [1], [2], [0, 0, 0, 1, 1, 2], [0], [0]>} : vector<4x8x8xbf16>, vector<4x8x8xbf16>, vector<4x8x8xf32> -> vector<4x8x8xf32>
    %62 = arith.truncf %61 : vector<4x8x8xf32> to vector<4x8x8xbf16>
    %cst_50 = arith.constant dense<0.000000e+00> : vector<4x8x32xf32>
    %63 = tpu.matmul %62, %23, %cst_50 {dimension_numbers = #tpu.dot_dimension_numbers<[2], [1], [1], [2], [0, 0, 0, 1, 1, 2], [0], [0]>} : vector<4x8x8xbf16>, vector<4x8x32xbf16>, vector<4x8x32xf32> -> vector<4x8x32xf32>
    %cst_51 = arith.constant dense<0.000000e+00> : vector<8x32xf32>
    %64 = vector.multi_reduction <add>, %63, %cst_51 [0] : vector<4x8x32xf32> to vector<8x32xf32>
    %65 = vector.broadcast %25 : vector<1x32xf32> to vector<8x32xf32>
    %66 = arith.addf %64, %65 : vector<8x32xf32>
    %67 = arith.addf %3, %66 : vector<8x32xf32>
    %c0_52 = arith.constant 0 : index
    %c0_53 = arith.constant 0 : index
    %c0_54 = arith.constant 0 : index
    %68 = vector.load %arg26[%c0_52, %c0_53, %c0_54] : memref<1x1x32xf32, #tpu.memory_space<vmem>>, vector<1x1x32xf32>
    %69 = vector.shape_cast %68 : vector<1x1x32xf32> to vector<1x32xf32>
    %c0_55 = arith.constant 0 : index
    %c0_56 = arith.constant 0 : index
    %c0_57 = arith.constant 0 : index
    %70 = vector.load %arg27[%c0_55, %c0_56, %c0_57] : memref<1x1x32xf32, #tpu.memory_space<vmem>>, vector<1x1x32xf32>
    %71 = vector.shape_cast %70 : vector<1x1x32xf32> to vector<1x32xf32>
    %cst_58 = arith.constant dense<0.000000e+00> : vector<8xf32>
    %72 = vector.multi_reduction <add>, %67, %cst_58 [1] : vector<8x32xf32> to vector<8xf32>
    %73 = vector.shape_cast %72 : vector<8xf32> to vector<8x1xf32>
    %cst_59 = arith.constant 3.200000e+01 : f32
    %74 = vector.broadcast %cst_59 : f32 to vector<8x1xf32>
    %75 = arith.divf %73, %74 : vector<8x1xf32>
    %76 = vector.broadcast %75 : vector<8x1xf32> to vector<8x32xf32>
    %77 = arith.subf %67, %76 : vector<8x32xf32>
    %78 = arith.mulf %77, %77 : vector<8x32xf32>
    %cst_60 = arith.constant dense<0.000000e+00> : vector<8xf32>
    %79 = vector.multi_reduction <add>, %78, %cst_60 [1] : vector<8x32xf32> to vector<8xf32>
    %80 = vector.shape_cast %79 : vector<8xf32> to vector<8x1xf32>
    %cst_61 = arith.constant 3.200000e+01 : f32
    %81 = vector.broadcast %cst_61 : f32 to vector<8x1xf32>
    %82 = arith.divf %80, %81 : vector<8x1xf32>
    %83 = vector.broadcast %75 : vector<8x1xf32> to vector<8x32xf32>
    %84 = arith.subf %67, %83 : vector<8x32xf32>
    %cst_62 = arith.constant 9.99999974E-6 : f32
    %85 = vector.broadcast %cst_62 : f32 to vector<8x1xf32>
    %86 = arith.addf %82, %85 : vector<8x1xf32>
    %87 = math.rsqrt %86 : vector<8x1xf32>
    %88 = vector.broadcast %87 : vector<8x1xf32> to vector<8x32xf32>
    %89 = arith.mulf %84, %88 : vector<8x32xf32>
    %90 = vector.broadcast %69 : vector<1x32xf32> to vector<8x32xf32>
    %91 = arith.mulf %89, %90 : vector<8x32xf32>
    %92 = vector.broadcast %71 : vector<1x32xf32> to vector<8x32xf32>
    %93 = arith.addf %91, %92 : vector<8x32xf32>
    %c0_63 = arith.constant 0 : index
    %c0_64 = arith.constant 0 : index
    %c0_65 = arith.constant 0 : index
    %c0_66 = arith.constant 0 : index
    %94 = vector.load %arg14[%c0_63, %c0_64, %c0_65, %c0_66] : memref<1x4x32x8xbf16, #tpu.memory_space<vmem>>, vector<1x4x32x8xbf16>
    %95 = vector.shape_cast %94 : vector<1x4x32x8xbf16> to vector<4x32x8xbf16>
    %c0_67 = arith.constant 0 : index
    %c0_68 = arith.constant 0 : index
    %c0_69 = arith.constant 0 : index
    %c0_70 = arith.constant 0 : index
    %96 = vector.load %arg15[%c0_67, %c0_68, %c0_69, %c0_70] : memref<1x4x1x8xf32, #tpu.memory_space<vmem>>, vector<1x4x1x8xf32>
    %97 = vector.shape_cast %96 : vector<1x4x1x8xf32> to vector<4x1x8xf32>
    %c0_71 = arith.constant 0 : index
    %c0_72 = arith.constant 0 : index
    %c0_73 = arith.constant 0 : index
    %c0_74 = arith.constant 0 : index
    %98 = vector.load %arg16[%c0_71, %c0_72, %c0_73, %c0_74] : memref<1x4x32x8xbf16, #tpu.memory_space<vmem>>, vector<1x4x32x8xbf16>
    %99 = vector.shape_cast %98 : vector<1x4x32x8xbf16> to vector<4x32x8xbf16>
    %c0_75 = arith.constant 0 : index
    %c0_76 = arith.constant 0 : index
    %c0_77 = arith.constant 0 : index
    %c0_78 = arith.constant 0 : index
    %100 = vector.load %arg17[%c0_75, %c0_76, %c0_77, %c0_78] : memref<1x4x1x8xf32, #tpu.memory_space<vmem>>, vector<1x4x1x8xf32>
    %101 = vector.shape_cast %100 : vector<1x4x1x8xf32> to vector<4x1x8xf32>
    %c0_79 = arith.constant 0 : index
    %c0_80 = arith.constant 0 : index
    %c0_81 = arith.constant 0 : index
    %c0_82 = arith.constant 0 : index
    %102 = vector.load %arg18[%c0_79, %c0_80, %c0_81, %c0_82] : memref<1x4x32x8xbf16, #tpu.memory_space<vmem>>, vector<1x4x32x8xbf16>
    %103 = vector.shape_cast %102 : vector<1x4x32x8xbf16> to vector<4x32x8xbf16>
    %c0_83 = arith.constant 0 : index
    %c0_84 = arith.constant 0 : index
    %c0_85 = arith.constant 0 : index
    %c0_86 = arith.constant 0 : index
    %104 = vector.load %arg19[%c0_83, %c0_84, %c0_85, %c0_86] : memref<1x4x1x8xf32, #tpu.memory_space<vmem>>, vector<1x4x1x8xf32>
    %105 = vector.shape_cast %104 : vector<1x4x1x8xf32> to vector<4x1x8xf32>
    %c0_87 = arith.constant 0 : index
    %c0_88 = arith.constant 0 : index
    %c0_89 = arith.constant 0 : index
    %c0_90 = arith.constant 0 : index
    %106 = vector.load %arg20[%c0_87, %c0_88, %c0_89, %c0_90] : memref<1x4x8x32xbf16, #tpu.memory_space<vmem>>, vector<1x4x8x32xbf16>
    %107 = vector.shape_cast %106 : vector<1x4x8x32xbf16> to vector<4x8x32xbf16>
    %c0_91 = arith.constant 0 : index
    %c0_92 = arith.constant 0 : index
    %c0_93 = arith.constant 0 : index
    %108 = vector.load %arg21[%c0_91, %c0_92, %c0_93] : memref<1x1x32xf32, #tpu.memory_space<vmem>>, vector<1x1x32xf32>
    %109 = vector.shape_cast %108 : vector<1x1x32xf32> to vector<1x32xf32>
    %110 = arith.truncf %93 : vector<8x32xf32> to vector<8x32xbf16>
    %111 = vector.shape_cast %110 : vector<8x32xbf16> to vector<1x8x32xbf16>
    %112 = vector.shape_cast %111 : vector<1x8x32xbf16> to vector<1x8x32xbf16>
    %113 = vector.broadcast %112 : vector<1x8x32xbf16> to vector<4x8x32xbf16>
    %114 = arith.truncf %5 : vector<8x32xf32> to vector<8x32xbf16>
    %115 = vector.shape_cast %114 : vector<8x32xbf16> to vector<1x8x32xbf16>
    %116 = vector.shape_cast %115 : vector<1x8x32xbf16> to vector<1x8x32xbf16>
    %117 = vector.broadcast %116 : vector<1x8x32xbf16> to vector<4x8x32xbf16>
    %cst_94 = arith.constant dense<0.000000e+00> : vector<4x8x8xf32>
    %118 = tpu.matmul %113, %95, %cst_94 {dimension_numbers = #tpu.dot_dimension_numbers<[2], [1], [1], [2], [0, 0, 0, 1, 1, 2], [0], [0]>} : vector<4x8x32xbf16>, vector<4x32x8xbf16>, vector<4x8x8xf32> -> vector<4x8x8xf32>
    %119 = vector.broadcast %97 : vector<4x1x8xf32> to vector<4x8x8xf32>
    %120 = arith.addf %118, %119 : vector<4x8x8xf32>
    %cst_95 = arith.constant dense<0.000000e+00> : vector<4x8x8xf32>
    %121 = tpu.matmul %117, %99, %cst_95 {dimension_numbers = #tpu.dot_dimension_numbers<[2], [1], [1], [2], [0, 0, 0, 1, 1, 2], [0], [0]>} : vector<4x8x32xbf16>, vector<4x32x8xbf16>, vector<4x8x8xf32> -> vector<4x8x8xf32>
    %122 = vector.broadcast %101 : vector<4x1x8xf32> to vector<4x8x8xf32>
    %123 = arith.addf %121, %122 : vector<4x8x8xf32>
    %cst_96 = arith.constant dense<0.000000e+00> : vector<4x8x8xf32>
    %124 = tpu.matmul %117, %103, %cst_96 {dimension_numbers = #tpu.dot_dimension_numbers<[2], [1], [1], [2], [0, 0, 0, 1, 1, 2], [0], [0]>} : vector<4x8x32xbf16>, vector<4x32x8xbf16>, vector<4x8x8xf32> -> vector<4x8x8xf32>
    %125 = vector.broadcast %105 : vector<4x1x8xf32> to vector<4x8x8xf32>
    %126 = arith.addf %124, %125 : vector<4x8x8xf32>
    %127 = arith.truncf %120 : vector<4x8x8xf32> to vector<4x8x8xbf16>
    %128 = arith.truncf %123 : vector<4x8x8xf32> to vector<4x8x8xbf16>
    %cst_97 = arith.constant dense<0.000000e+00> : vector<4x8x8xf32>
    %129 = tpu.matmul %127, %128, %cst_97 {dimension_numbers = #tpu.dot_dimension_numbers<[2], [2], [1], [1], [0, 0, 0, 1, 1, 1], [0], [0]>} : vector<4x8x8xbf16>, vector<4x8x8xbf16>, vector<4x8x8xf32> -> vector<4x8x8xf32>
    %130 = vector.shape_cast %9 : vector<8x8xbf16> to vector<1x8x8xbf16>
    %cst_98 = arith.constant 0.000000e+00 : bf16
    %131 = vector.broadcast %cst_98 : bf16 to vector<1x8x8xbf16>
    %132 = arith.cmpf oeq, %130, %131 : vector<1x8x8xbf16>
    %cst_99 = arith.constant -1.000000e+09 : f32
    %133 = vector.shape_cast %132 : vector<1x8x8xi1> to vector<1x8x8xi1>
    %134 = vector.broadcast %133 : vector<1x8x8xi1> to vector<4x8x8xi1>
    %135 = vector.broadcast %cst_99 : f32 to vector<4x8x8xf32>
    %136 = arith.select %134, %135, %129 : vector<4x8x8xi1>, vector<4x8x8xf32>
    %cst_100 = arith.constant dense<0xFF800000> : vector<4x8xf32>
    %137 = vector.multi_reduction <maximumf>, %136, %cst_100 [2] : vector<4x8x8xf32> to vector<4x8xf32>
    %138 = vector.shape_cast %137 : vector<4x8xf32> to vector<4x8x1xf32>
    %139 = vector.broadcast %138 : vector<4x8x1xf32> to vector<4x8x8xf32>
    %140 = arith.subf %136, %139 : vector<4x8x8xf32>
    %141 = math.exp %140 : vector<4x8x8xf32>
    %cst_101 = arith.constant dense<0.000000e+00> : vector<4x8xf32>
    %142 = vector.multi_reduction <add>, %141, %cst_101 [2] : vector<4x8x8xf32> to vector<4x8xf32>
    %143 = vector.shape_cast %142 : vector<4x8xf32> to vector<4x8x1xf32>
    %144 = tpu.reciprocal %143 {approx = true} : vector<4x8x1xf32> -> vector<4x8x1xf32>
    %145 = vector.broadcast %144 : vector<4x8x1xf32> to vector<4x8x8xf32>
    %146 = arith.mulf %141, %145 : vector<4x8x8xf32>
    %147 = arith.truncf %146 : vector<4x8x8xf32> to vector<4x8x8xbf16>
    %148 = arith.truncf %126 : vector<4x8x8xf32> to vector<4x8x8xbf16>
    %cst_102 = arith.constant dense<0.000000e+00> : vector<4x8x8xf32>
    %149 = tpu.matmul %147, %148, %cst_102 {dimension_numbers = #tpu.dot_dimension_numbers<[2], [1], [1], [2], [0, 0, 0, 1, 1, 2], [0], [0]>} : vector<4x8x8xbf16>, vector<4x8x8xbf16>, vector<4x8x8xf32> -> vector<4x8x8xf32>
    %150 = arith.truncf %149 : vector<4x8x8xf32> to vector<4x8x8xbf16>
    %cst_103 = arith.constant dense<0.000000e+00> : vector<4x8x32xf32>
    %151 = tpu.matmul %150, %107, %cst_103 {dimension_numbers = #tpu.dot_dimension_numbers<[2], [1], [1], [2], [0, 0, 0, 1, 1, 2], [0], [0]>} : vector<4x8x8xbf16>, vector<4x8x32xbf16>, vector<4x8x32xf32> -> vector<4x8x32xf32>
    %cst_104 = arith.constant dense<0.000000e+00> : vector<8x32xf32>
    %152 = vector.multi_reduction <add>, %151, %cst_104 [0] : vector<4x8x32xf32> to vector<8x32xf32>
    %153 = vector.broadcast %109 : vector<1x32xf32> to vector<8x32xf32>
    %154 = arith.addf %152, %153 : vector<8x32xf32>
    %155 = arith.addf %93, %154 : vector<8x32xf32>
    %c0_105 = arith.constant 0 : index
    %c0_106 = arith.constant 0 : index
    %c0_107 = arith.constant 0 : index
    %156 = vector.load %arg28[%c0_105, %c0_106, %c0_107] : memref<1x1x32xf32, #tpu.memory_space<vmem>>, vector<1x1x32xf32>
    %157 = vector.shape_cast %156 : vector<1x1x32xf32> to vector<1x32xf32>
    %c0_108 = arith.constant 0 : index
    %c0_109 = arith.constant 0 : index
    %c0_110 = arith.constant 0 : index
    %158 = vector.load %arg29[%c0_108, %c0_109, %c0_110] : memref<1x1x32xf32, #tpu.memory_space<vmem>>, vector<1x1x32xf32>
    %159 = vector.shape_cast %158 : vector<1x1x32xf32> to vector<1x32xf32>
    %cst_111 = arith.constant dense<0.000000e+00> : vector<8xf32>
    %160 = vector.multi_reduction <add>, %155, %cst_111 [1] : vector<8x32xf32> to vector<8xf32>
    %161 = vector.shape_cast %160 : vector<8xf32> to vector<8x1xf32>
    %cst_112 = arith.constant 3.200000e+01 : f32
    %162 = vector.broadcast %cst_112 : f32 to vector<8x1xf32>
    %163 = arith.divf %161, %162 : vector<8x1xf32>
    %164 = vector.broadcast %163 : vector<8x1xf32> to vector<8x32xf32>
    %165 = arith.subf %155, %164 : vector<8x32xf32>
    %166 = arith.mulf %165, %165 : vector<8x32xf32>
    %cst_113 = arith.constant dense<0.000000e+00> : vector<8xf32>
    %167 = vector.multi_reduction <add>, %166, %cst_113 [1] : vector<8x32xf32> to vector<8xf32>
    %168 = vector.shape_cast %167 : vector<8xf32> to vector<8x1xf32>
    %cst_114 = arith.constant 3.200000e+01 : f32
    %169 = vector.broadcast %cst_114 : f32 to vector<8x1xf32>
    %170 = arith.divf %168, %169 : vector<8x1xf32>
    %171 = vector.broadcast %163 : vector<8x1xf32> to vector<8x32xf32>
    %172 = arith.subf %155, %171 : vector<8x32xf32>
    %cst_115 = arith.constant 9.99999974E-6 : f32
    %173 = vector.broadcast %cst_115 : f32 to vector<8x1xf32>
    %174 = arith.addf %170, %173 : vector<8x1xf32>
    %175 = math.rsqrt %174 : vector<8x1xf32>
    %176 = vector.broadcast %175 : vector<8x1xf32> to vector<8x32xf32>
    %177 = arith.mulf %172, %176 : vector<8x32xf32>
    %178 = vector.broadcast %157 : vector<1x32xf32> to vector<8x32xf32>
    %179 = arith.mulf %177, %178 : vector<8x32xf32>
    %180 = vector.broadcast %159 : vector<1x32xf32> to vector<8x32xf32>
    %181 = arith.addf %179, %180 : vector<8x32xf32>
    %c0_116 = arith.constant 0 : index
    %c0_117 = arith.constant 0 : index
    %c0_118 = arith.constant 0 : index
    %182 = vector.load %arg22[%c0_116, %c0_117, %c0_118] : memref<1x32x64xbf16, #tpu.memory_space<vmem>>, vector<1x32x64xbf16>
    %183 = vector.shape_cast %182 : vector<1x32x64xbf16> to vector<32x64xbf16>
    %c0_119 = arith.constant 0 : index
    %c0_120 = arith.constant 0 : index
    %c0_121 = arith.constant 0 : index
    %184 = vector.load %arg23[%c0_119, %c0_120, %c0_121] : memref<1x1x64xf32, #tpu.memory_space<vmem>>, vector<1x1x64xf32>
    %185 = vector.shape_cast %184 : vector<1x1x64xf32> to vector<1x64xf32>
    %c0_122 = arith.constant 0 : index
    %c0_123 = arith.constant 0 : index
    %c0_124 = arith.constant 0 : index
    %186 = vector.load %arg24[%c0_122, %c0_123, %c0_124] : memref<1x64x32xbf16, #tpu.memory_space<vmem>>, vector<1x64x32xbf16>
    %187 = vector.shape_cast %186 : vector<1x64x32xbf16> to vector<64x32xbf16>
    %c0_125 = arith.constant 0 : index
    %c0_126 = arith.constant 0 : index
    %c0_127 = arith.constant 0 : index
    %188 = vector.load %arg25[%c0_125, %c0_126, %c0_127] : memref<1x1x32xf32, #tpu.memory_space<vmem>>, vector<1x1x32xf32>
    %189 = vector.shape_cast %188 : vector<1x1x32xf32> to vector<1x32xf32>
    %190 = arith.truncf %181 : vector<8x32xf32> to vector<8x32xbf16>
    %cst_128 = arith.constant dense<0.000000e+00> : vector<8x64xf32>
    %191 = tpu.matmul %190, %183, %cst_128 {dimension_numbers = #tpu.dot_dimension_numbers<[1], [0], [0], [1], [0, 0, 1, 1], [], []>} : vector<8x32xbf16>, vector<32x64xbf16>, vector<8x64xf32> -> vector<8x64xf32>
    %192 = vector.broadcast %185 : vector<1x64xf32> to vector<8x64xf32>
    %193 = arith.addf %191, %192 : vector<8x64xf32>
    %cst_129 = arith.constant 0.000000e+00 : f32
    %194 = vector.broadcast %cst_129 : f32 to vector<8x64xf32>
    %195 = arith.maximumf %193, %194 : vector<8x64xf32>
    %196 = arith.truncf %195 : vector<8x64xf32> to vector<8x64xbf16>
    %cst_130 = arith.constant dense<0.000000e+00> : vector<8x32xf32>
    %197 = tpu.matmul %196, %187, %cst_130 {dimension_numbers = #tpu.dot_dimension_numbers<[1], [0], [0], [1], [0, 0, 1, 1], [], []>} : vector<8x64xbf16>, vector<64x32xbf16>, vector<8x32xf32> -> vector<8x32xf32>
    %198 = vector.broadcast %189 : vector<1x32xf32> to vector<8x32xf32>
    %199 = arith.addf %197, %198 : vector<8x32xf32>
    %200 = arith.addf %181, %199 : vector<8x32xf32>
    %c0_131 = arith.constant 0 : index
    %c0_132 = arith.constant 0 : index
    %c0_133 = arith.constant 0 : index
    %201 = vector.load %arg30[%c0_131, %c0_132, %c0_133] : memref<1x1x32xf32, #tpu.memory_space<vmem>>, vector<1x1x32xf32>
    %202 = vector.shape_cast %201 : vector<1x1x32xf32> to vector<1x32xf32>
    %c0_134 = arith.constant 0 : index
    %c0_135 = arith.constant 0 : index
    %c0_136 = arith.constant 0 : index
    %203 = vector.load %arg31[%c0_134, %c0_135, %c0_136] : memref<1x1x32xf32, #tpu.memory_space<vmem>>, vector<1x1x32xf32>
    %204 = vector.shape_cast %203 : vector<1x1x32xf32> to vector<1x32xf32>
    %cst_137 = arith.constant dense<0.000000e+00> : vector<8xf32>
    %205 = vector.multi_reduction <add>, %200, %cst_137 [1] : vector<8x32xf32> to vector<8xf32>
    %206 = vector.shape_cast %205 : vector<8xf32> to vector<8x1xf32>
    %cst_138 = arith.constant 3.200000e+01 : f32
    %207 = vector.broadcast %cst_138 : f32 to vector<8x1xf32>
    %208 = arith.divf %206, %207 : vector<8x1xf32>
    %209 = vector.broadcast %208 : vector<8x1xf32> to vector<8x32xf32>
    %210 = arith.subf %200, %209 : vector<8x32xf32>
    %211 = arith.mulf %210, %210 : vector<8x32xf32>
    %cst_139 = arith.constant dense<0.000000e+00> : vector<8xf32>
    %212 = vector.multi_reduction <add>, %211, %cst_139 [1] : vector<8x32xf32> to vector<8xf32>
    %213 = vector.shape_cast %212 : vector<8xf32> to vector<8x1xf32>
    %cst_140 = arith.constant 3.200000e+01 : f32
    %214 = vector.broadcast %cst_140 : f32 to vector<8x1xf32>
    %215 = arith.divf %213, %214 : vector<8x1xf32>
    %216 = vector.broadcast %208 : vector<8x1xf32> to vector<8x32xf32>
    %217 = arith.subf %200, %216 : vector<8x32xf32>
    %cst_141 = arith.constant 9.99999974E-6 : f32
    %218 = vector.broadcast %cst_141 : f32 to vector<8x1xf32>
    %219 = arith.addf %215, %218 : vector<8x1xf32>
    %220 = math.rsqrt %219 : vector<8x1xf32>
    %221 = vector.broadcast %220 : vector<8x1xf32> to vector<8x32xf32>
    %222 = arith.mulf %217, %221 : vector<8x32xf32>
    %223 = vector.broadcast %202 : vector<1x32xf32> to vector<8x32xf32>
    %224 = arith.mulf %222, %223 : vector<8x32xf32>
    %225 = vector.broadcast %204 : vector<1x32xf32> to vector<8x32xf32>
    %226 = arith.addf %224, %225 : vector<8x32xf32>
    %c0_142 = arith.constant 0 : index
    %c0_143 = arith.constant 0 : index
    %227 = vector.load %arg35[%c0_142, %c0_143] : memref<8x32xf32, #tpu.memory_space<vmem>>, vector<8x32xf32>
    tpu.vector_store %arg35[%c0_142, %c0_143], %226 {strides = array<i32>} : memref<8x32xf32, #tpu.memory_space<vmem>>, vector<8x32xf32>,
    %c1_i32 = arith.constant 1 : i32
    %228 = arith.cmpi eq, %arg1, %c1_i32 : i32
    %229 = arith.extui %228 : i1 to i32
    %c0_i32_144 = arith.constant 0 : i32
    %230 = arith.cmpi ne, %229, %c0_i32_144 : i32
    scf.if %230 {
      %c0_145 = arith.constant 0 : index
      %c0_146 = arith.constant 0 : index
      %231 = vector.load %arg32[%c0_145, %c0_146] : memref<1x32xf32, #tpu.memory_space<vmem>>, vector<1x32xf32>
      %c0_147 = arith.constant 0 : index
      %c0_148 = arith.constant 0 : index
      %232 = vector.load %arg33[%c0_147, %c0_148] : memref<1x32xf32, #tpu.memory_space<vmem>>, vector<1x32xf32>
      %cst_149 = arith.constant dense<0.000000e+00> : vector<8xf32>
      %233 = vector.multi_reduction <add>, %226, %cst_149 [1] : vector<8x32xf32> to vector<8xf32>
      %234 = vector.shape_cast %233 : vector<8xf32> to vector<8x1xf32>
      %cst_150 = arith.constant 3.200000e+01 : f32
      %235 = vector.broadcast %cst_150 : f32 to vector<8x1xf32>
      %236 = arith.divf %234, %235 : vector<8x1xf32>
      %237 = vector.broadcast %236 : vector<8x1xf32> to vector<8x32xf32>
      %238 = arith.subf %226, %237 : vector<8x32xf32>
      %239 = arith.mulf %238, %238 : vector<8x32xf32>
      %cst_151 = arith.constant dense<0.000000e+00> : vector<8xf32>
      %240 = vector.multi_reduction <add>, %239, %cst_151 [1] : vector<8x32xf32> to vector<8xf32>
      %241 = vector.shape_cast %240 : vector<8xf32> to vector<8x1xf32>
      %cst_152 = arith.constant 3.200000e+01 : f32
      %242 = vector.broadcast %cst_152 : f32 to vector<8x1xf32>
      %243 = arith.divf %241, %242 : vector<8x1xf32>
      %244 = vector.broadcast %236 : vector<8x1xf32> to vector<8x32xf32>
      %245 = arith.subf %226, %244 : vector<8x32xf32>
      %cst_153 = arith.constant 9.99999974E-6 : f32
      %246 = vector.broadcast %cst_153 : f32 to vector<8x1xf32>
      %247 = arith.addf %243, %246 : vector<8x1xf32>
      %248 = math.rsqrt %247 : vector<8x1xf32>
      %249 = vector.broadcast %248 : vector<8x1xf32> to vector<8x32xf32>
      %250 = arith.mulf %245, %249 : vector<8x32xf32>
      %251 = vector.broadcast %231 : vector<1x32xf32> to vector<8x32xf32>
      %252 = arith.mulf %250, %251 : vector<8x32xf32>
      %253 = vector.broadcast %232 : vector<1x32xf32> to vector<8x32xf32>
      %254 = arith.addf %252, %253 : vector<8x32xf32>
      %c0_154 = arith.constant 0 : index
      %c0_155 = arith.constant 0 : index
      %c0_156 = arith.constant 0 : index
      %255 = vector.load %arg34[%c0_154, %c0_155, %c0_156] : memref<1x8x32xf32, #tpu.memory_space<vmem>>, vector<1x8x32xf32>
      %256 = vector.shape_cast %255 : vector<1x8x32xf32> to vector<8x32xf32>
      %257 = vector.shape_cast %254 : vector<8x32xf32> to vector<1x8x32xf32>
      tpu.vector_store %arg34[%c0_154, %c0_155, %c0_156], %257 {strides = array<i32>} : memref<1x8x32xf32, #tpu.memory_space<vmem>>, vector<1x8x32xf32>,
    } else {
    }
    return
  }
  func.func @transform_0(%arg0: i32, %arg1: i32) -> (i32, i32, i32) {
    %c0_i32 = arith.constant 0 : i32
    %c0_i32_0 = arith.constant 0 : i32
    %c0_i32_1 = arith.constant 0 : i32
    return %arg0, %c0_i32, %c0_i32_0 : i32, i32, i32
  }
  func.func @transform_1(%arg0: i32, %arg1: i32) -> (i32, i32, i32) {
    %c0_i32 = arith.constant 0 : i32
    %c0_i32_0 = arith.constant 0 : i32
    %c0_i32_1 = arith.constant 0 : i32
    return %arg0, %c0_i32, %c0_i32_0 : i32, i32, i32
  }
  func.func @transform_2(%arg0: i32, %arg1: i32) -> (i32, i32, i32) {
    %c0_i32 = arith.constant 0 : i32
    %c0_i32_0 = arith.constant 0 : i32
    %c0_i32_1 = arith.constant 0 : i32
    return %arg0, %c0_i32, %c0_i32_0 : i32, i32, i32
  }
  func.func @transform_3(%arg0: i32, %arg1: i32) -> (i32, i32, i32) {
    %c0_i32 = arith.constant 0 : i32
    %c0_i32_0 = arith.constant 0 : i32
    %c0_i32_1 = arith.constant 0 : i32
    return %arg0, %c0_i32, %c0_i32_0 : i32, i32, i32
  }
  func.func @transform_4(%arg0: i32, %arg1: i32) -> (i32, i32, i32, i32) {
    %c0_i32 = arith.constant 0 : i32
    %c0_i32_0 = arith.constant 0 : i32
    %c0_i32_1 = arith.constant 0 : i32
    %c0_i32_2 = arith.constant 0 : i32
    return %arg1, %c0_i32, %c0_i32_0, %c0_i32_1 : i32, i32, i32, i32
  }
  func.func @transform_5(%arg0: i32, %arg1: i32) -> (i32, i32, i32, i32) {
    %c0_i32 = arith.constant 0 : i32
    %c0_i32_0 = arith.constant 0 : i32
    %c0_i32_1 = arith.constant 0 : i32
    %c0_i32_2 = arith.constant 0 : i32
    return %arg1, %c0_i32, %c0_i32_0, %c0_i32_1 : i32, i32, i32, i32
  }
  func.func @transform_6(%arg0: i32, %arg1: i32) -> (i32, i32, i32, i32) {
    %c0_i32 = arith.constant 0 : i32
    %c0_i32_0 = arith.constant 0 : i32
    %c0_i32_1 = arith.constant 0 : i32
    %c0_i32_2 = arith.constant 0 : i32
    return %arg1, %c0_i32, %c0_i32_0, %c0_i32_1 : i32, i32, i32, i32
  }
  func.func @transform_7(%arg0: i32, %arg1: i32) -> (i32, i32, i32, i32) {
    %c0_i32 = arith.constant 0 : i32
    %c0_i32_0 = arith.constant 0 : i32
    %c0_i32_1 = arith.constant 0 : i32
    %c0_i32_2 = arith.constant 0 : i32
    return %arg1, %c0_i32, %c0_i32_0, %c0_i32_1 : i32, i32, i32, i32
  }
  func.func @transform_8(%arg0: i32, %arg1: i32) -> (i32, i32, i32, i32) {
    %c0_i32 = arith.constant 0 : i32
    %c0_i32_0 = arith.constant 0 : i32
    %c0_i32_1 = arith.constant 0 : i32
    %c0_i32_2 = arith.constant 0 : i32
    return %arg1, %c0_i32, %c0_i32_0, %c0_i32_1 : i32, i32, i32, i32
  }
  func.func @transform_9(%arg0: i32, %arg1: i32) -> (i32, i32, i32, i32) {
    %c0_i32 = arith.constant 0 : i32
    %c0_i32_0 = arith.constant 0 : i32
    %c0_i32_1 = arith.constant 0 : i32
    %c0_i32_2 = arith.constant 0 : i32
    return %arg1, %c0_i32, %c0_i32_0, %c0_i32_1 : i32, i32, i32, i32
  }
  func.func @transform_10(%arg0: i32, %arg1: i32) -> (i32, i32, i32, i32) {
    %c0_i32 = arith.constant 0 : i32
    %c0_i32_0 = arith.constant 0 : i32
    %c0_i32_1 = arith.constant 0 : i32
    %c0_i32_2 = arith.constant 0 : i32
    return %arg1, %c0_i32, %c0_i32_0, %c0_i32_1 : i32, i32, i32, i32
  }
  func.func @transform_11(%arg0: i32, %arg1: i32) -> (i32, i32, i32) {
    %c0_i32 = arith.constant 0 : i32
    %c0_i32_0 = arith.constant 0 : i32
    %c0_i32_1 = arith.constant 0 : i32
    return %arg1, %c0_i32, %c0_i32_0 : i32, i32, i32
  }
  func.func @transform_12(%arg0: i32, %arg1: i32) -> (i32, i32, i32, i32) {
    %c0_i32 = arith.constant 0 : i32
    %c0_i32_0 = arith.constant 0 : i32
    %c0_i32_1 = arith.constant 0 : i32
    %c0_i32_2 = arith.constant 0 : i32
    return %arg1, %c0_i32, %c0_i32_0, %c0_i32_1 : i32, i32, i32, i32
  }
  func.func @transform_13(%arg0: i32, %arg1: i32) -> (i32, i32, i32, i32) {
    %c0_i32 = arith.constant 0 : i32
    %c0_i32_0 = arith.constant 0 : i32
    %c0_i32_1 = arith.constant 0 : i32
    %c0_i32_2 = arith.constant 0 : i32
    return %arg1, %c0_i32, %c0_i32_0, %c0_i32_1 : i32, i32, i32, i32
  }
  func.func @transform_14(%arg0: i32, %arg1: i32) -> (i32, i32, i32, i32) {
    %c0_i32 = arith.constant 0 : i32
    %c0_i32_0 = arith.constant 0 : i32
    %c0_i32_1 = arith.constant 0 : i32
    %c0_i32_2 = arith.constant 0 : i32
    return %arg1, %c0_i32, %c0_i32_0, %c0_i32_1 : i32, i32, i32, i32
  }
  func.func @transform_15(%arg0: i32, %arg1: i32) -> (i32, i32, i32, i32) {
    %c0_i32 = arith.constant 0 : i32
    %c0_i32_0 = arith.constant 0 : i32
    %c0_i32_1 = arith.constant 0 : i32
    %c0_i32_2 = arith.constant 0 : i32
    return %arg1, %c0_i32, %c0_i32_0, %c0_i32_1 : i32, i32, i32, i32
  }
  func.func @transform_16(%arg0: i32, %arg1: i32) -> (i32, i32, i32, i32) {
    %c0_i32 = arith.constant 0 : i32
    %c0_i32_0 = arith.constant 0 : i32
    %c0_i32_1 = arith.constant 0 : i32
    %c0_i32_2 = arith.constant 0 : i32
    return %arg1, %c0_i32, %c0_i32_0, %c0_i32_1 : i32, i32, i32, i32
  }
  func.func @transform_17(%arg0: i32, %arg1: i32) -> (i32, i32, i32, i32) {
    %c0_i32 = arith.constant 0 : i32
    %c0_i32_0 = arith.constant 0 : i32
    %c0_i32_1 = arith.constant 0 : i32
    %c0_i32_2 = arith.constant 0 : i32
    return %arg1, %c0_i32, %c0_i32_0, %c0_i32_1 : i32, i32, i32, i32
  }
  func.func @transform_18(%arg0: i32, %arg1: i32) -> (i32, i32, i32, i32) {
    %c0_i32 = arith.constant 0 : i32
    %c0_i32_0 = arith.constant 0 : i32
    %c0_i32_1 = arith.constant 0 : i32
    %c0_i32_2 = arith.constant 0 : i32
    return %arg1, %c0_i32, %c0_i32_0, %c0_i32_1 : i32, i32, i32, i32
  }
  func.func @transform_19(%arg0: i32, %arg1: i32) -> (i32, i32, i32) {
    %c0_i32 = arith.constant 0 : i32
    %c0_i32_0 = arith.constant 0 : i32
    %c0_i32_1 = arith.constant 0 : i32
    return %arg1, %c0_i32, %c0_i32_0 : i32, i32, i32
  }
  func.func @transform_20(%arg0: i32, %arg1: i32) -> (i32, i32, i32) {
    %c0_i32 = arith.constant 0 : i32
    %c0_i32_0 = arith.constant 0 : i32
    %c0_i32_1 = arith.constant 0 : i32
    return %arg1, %c0_i32, %c0_i32_0 : i32, i32, i32
  }
  func.func @transform_21(%arg0: i32, %arg1: i32) -> (i32, i32, i32) {
    %c0_i32 = arith.constant 0 : i32
    %c0_i32_0 = arith.constant 0 : i32
    %c0_i32_1 = arith.constant 0 : i32
    return %arg1, %c0_i32, %c0_i32_0 : i32, i32, i32
  }
  func.func @transform_22(%arg0: i32, %arg1: i32) -> (i32, i32, i32) {
    %c0_i32 = arith.constant 0 : i32
    %c0_i32_0 = arith.constant 0 : i32
    %c0_i32_1 = arith.constant 0 : i32
    return %arg1, %c0_i32, %c0_i32_0 : i32, i32, i32
  }
  func.func @transform_23(%arg0: i32, %arg1: i32) -> (i32, i32, i32) {
    %c0_i32 = arith.constant 0 : i32
    %c0_i32_0 = arith.constant 0 : i32
    %c0_i32_1 = arith.constant 0 : i32
    return %arg1, %c0_i32, %c0_i32_0 : i32, i32, i32
  }
  func.func @transform_24(%arg0: i32, %arg1: i32) -> (i32, i32, i32) {
    %c0_i32 = arith.constant 0 : i32
    %c0_i32_0 = arith.constant 0 : i32
    %c0_i32_1 = arith.constant 0 : i32
    return %arg1, %c0_i32, %c0_i32_0 : i32, i32, i32
  }
  func.func @transform_25(%arg0: i32, %arg1: i32) -> (i32, i32, i32) {
    %c0_i32 = arith.constant 0 : i32
    %c0_i32_0 = arith.constant 0 : i32
    %c0_i32_1 = arith.constant 0 : i32
    return %arg1, %c0_i32, %c0_i32_0 : i32, i32, i32
  }
  func.func @transform_26(%arg0: i32, %arg1: i32) -> (i32, i32, i32) {
    %c0_i32 = arith.constant 0 : i32
    %c0_i32_0 = arith.constant 0 : i32
    %c0_i32_1 = arith.constant 0 : i32
    return %arg1, %c0_i32, %c0_i32_0 : i32, i32, i32
  }
  func.func @transform_27(%arg0: i32, %arg1: i32) -> (i32, i32, i32) {
    %c0_i32 = arith.constant 0 : i32
    %c0_i32_0 = arith.constant 0 : i32
    %c0_i32_1 = arith.constant 0 : i32
    return %arg1, %c0_i32, %c0_i32_0 : i32, i32, i32
  }
  func.func @transform_28(%arg0: i32, %arg1: i32) -> (i32, i32, i32) {
    %c0_i32 = arith.constant 0 : i32
    %c0_i32_0 = arith.constant 0 : i32
    %c0_i32_1 = arith.constant 0 : i32
    return %arg1, %c0_i32, %c0_i32_0 : i32, i32, i32
  }
  func.func @transform_29(%arg0: i32, %arg1: i32) -> (i32, i32, i32) {
    %c0_i32 = arith.constant 0 : i32
    %c0_i32_0 = arith.constant 0 : i32
    %c0_i32_1 = arith.constant 0 : i32
    return %arg1, %c0_i32, %c0_i32_0 : i32, i32, i32
  }
  func.func @transform_30(%arg0: i32, %arg1: i32) -> (i32, i32) {
    %c0_i32 = arith.constant 0 : i32
    %c0_i32_0 = arith.constant 0 : i32
    %c0_i32_1 = arith.constant 0 : i32
    return %c0_i32, %c0_i32_0 : i32, i32
  }
  func.func @transform_31(%arg0: i32, %arg1: i32) -> (i32, i32) {
    %c0_i32 = arith.constant 0 : i32
    %c0_i32_0 = arith.constant 0 : i32
    %c0_i32_1 = arith.constant 0 : i32
    return %c0_i32, %c0_i32_0 : i32, i32
  }
  func.func @transform_32(%arg0: i32, %arg1: i32) -> (i32, i32, i32) {
    %c0_i32 = arith.constant 0 : i32
    %c0_i32_0 = arith.constant 0 : i32
    %c0_i32_1 = arith.constant 0 : i32
    return %arg0, %c0_i32, %c0_i32_0 : i32, i32, i32
  }
}

</mosaic_0001>

<bundles_post_ra>
// kernel: tpu_custom_call.1
= control target key start
LH: loop header
LB: loop body
LE: loop exit
PB: predicated region body
PF: predicated region fallthrough
CT: control target
= control target key end

     0   :  { %s6000_s6 = smov 1   ;;  %s6001_s10 = smov 2   ;;  %s6886_s0 = inlined_call_operand.smem [shape: u32[33], index: -1, kind: input, shape index: {}] }
   0x1   :  { %s6044_s5 = sld [smem:[%s6886_s0]]   ;;  %s6002_s14 = smov 3  }
   0x2   :  { %s6049_s9 = sld [smem:[%s6886_s0 + %s6000_s6]]   ;;  %s6003_s18 = smov 4  }
   0x3   :  { %s6054_s13 = sld [smem:[%s6886_s0 + %s6001_s10]]   ;;  %s6004_s22 = smov 5  }
   0x4   :  { %s6059_s17 = sld [smem:[%s6886_s0 + %s6002_s14]]   ;;  %s6005_s26 = smov 6  }
   0x5   :  { %s6064_s21 = sld [smem:[%s6886_s0 + %s6003_s18]]   ;;  %s6006_s30 = smov 7  }
   0x6   :  { %s6069_s25 = sld [smem:[%s6886_s0 + %s6004_s22]]   ;;  %s6007_s4 = smov 8  }
   0x7   :  { %6914 = sst [smem:[#allocation6_spill]] %s6044_s5  ;;  %s6008_s10 = smov 9  }
   0x8   :  { %6915 = sst [smem:[#allocation7_spill]] %s6049_s9  ;;  %s6009_s15 = smov 10  }
   0x9   :  { %6916 = sst [smem:[#allocation8_spill]] %s6054_s13  ;;  %s6010_s20 = smov 11  }
   0xa   :  { %6917 = sst [smem:[#allocation9_spill]] %s6059_s17  ;;  %s6012_s1 = smov 13  }
   0xb   :  { %6918 = sst [smem:[#allocation10_spill]] %s6064_s21  ;;  %s6013_s7 = smov 14  }
   0xc   :  { %6919 = sst [smem:[#allocation11_spill]] %s6069_s25  ;;  %s6015_s22 = smov 16  }
   0xd   :  { %s6074_s29 = sld [smem:[%s6886_s0 + %s6005_s26]]   ;;  %s6011_s26 = smov 12  }
   0xe   :  { %s6079_s3 = sld [smem:[%s6886_s0 + %s6006_s30]]   ;;  %s6016_s28 = smov 17  }
   0xf   :  { %s6084_s8 = sld [smem:[%s6886_s0 + %s6007_s4]]  }
  0x10   :  { %s6089_s14 = sld [smem:[%s6886_s0 + %s6008_s10]]  }
  0x11   :  { %s6094_s19 = sld [smem:[%s6886_s0 + %s6009_s15]]   ;;  %s6014_s15 = smov 15  }
  0x12   :  { %s6099_s24 = sld [smem:[%s6886_s0 + %s6010_s20]]  }
  0x13   :  { %6920 = sst [smem:[#allocation12_spill]] %s6074_s29 }
  0x14   :  { %6921 = sst [smem:[#allocation13_spill]] %s6079_s3 }
  0x15   :  { %6922 = sst [smem:[#allocation14_spill]] %s6084_s8 }
  0x16   :  { %6923 = sst [smem:[#allocation15_spill]] %s6089_s14 }
  0x17   :  { %6924 = sst [smem:[#allocation16_spill]] %s6094_s19 }
  0x18   :  { %6925 = sst [smem:[#allocation17_spill]] %s6099_s24 }
  0x19   :  { %s6104_s30 = sld [smem:[%s6886_s0 + %s6011_s26]]  }
  0x1a   :  { %s6109_s6 = sld [smem:[%s6886_s0 + %s6012_s1]]  }
  0x1b   :  { %s6114_s12 = sld [smem:[%s6886_s0 + %s6013_s7]]   ;;  %s6017_s7 = smov 18  }
  0x1c   :  { %s6119_s20 = sld [smem:[%s6886_s0 + %s6014_s15]]   ;;  %s6018_s15 = smov 19  }
  0x1d   :  { %s6124_s27 = sld [smem:[%s6886_s0 + %s6015_s22]]   ;;  %s6019_s22 = smov 20  }
  0x1e   :  { %s6129_s4 = sld [smem:[%s6886_s0 + %s6016_s28]]   ;;  %s6020_s28 = smov 21  }
  0x1f   :  { %6926 = sst [smem:[#allocation18_spill]] %s6104_s30 }
  0x20   :  { %6927 = sst [smem:[#allocation19_spill]] %s6109_s6 }
  0x21   :  { %6928 = sst [smem:[#allocation20_spill]] %s6114_s12 }
  0x22   :  { %6929 = sst [smem:[#allocation21_spill]] %s6119_s20 }
  0x23   :  { %6930 = sst [smem:[#allocation22_spill]] %s6124_s27 }
  0x24   :  { %6931 = sst [smem:[#allocation23_spill]] %s6129_s4 }
  0x25   :  { %s6134_s12 = sld [smem:[%s6886_s0 + %s6017_s7]]   ;;  %s6021_s7 = smov 22  }
  0x26   :  { %s6139_s20 = sld [smem:[%s6886_s0 + %s6018_s15]]   ;;  %s6022_s15 = smov 23  }
  0x27   :  { %s6144_s27 = sld [smem:[%s6886_s0 + %s6019_s22]]   ;;  %s6023_s22 = smov 24  }
  0x28   :  { %s6149_s4 = sld [smem:[%s6886_s0 + %s6020_s28]]   ;;  %s6024_s28 = smov 25  }
  0x2b   :  { %6932 = sst [smem:[#allocation24_spill]] %s6134_s12 }
  0x2c   :  { %6933 = sst [smem:[#allocation25_spill]] %s6139_s20 }
  0x2d   :  { %6934 = sst [smem:[#allocation26_spill]] %s6144_s27 }
  0x2e   :  { %6935 = sst [smem:[#allocation27_spill]] %s6149_s4 }
  0x2f   :  { %s6154_s12 = sld [smem:[%s6886_s0 + %s6021_s7]]   ;;  %s6025_s7 = smov 26  }
  0x30   :  { %s6159_s20 = sld [smem:[%s6886_s0 + %s6022_s15]]   ;;  %s6026_s15 = smov 27  }
  0x31   :  { %s6164_s27 = sld [smem:[%s6886_s0 + %s6023_s22]]   ;;  %s6027_s22 = smov 28  }
  0x32   :  { %s6169_s4 = sld [smem:[%s6886_s0 + %s6024_s28]]   ;;  %s6028_s28 = smov 29  }
  0x35   :  { %6936 = sst [smem:[#allocation28_spill]] %s6154_s12 }
  0x36   :  { %6937 = sst [smem:[#allocation29_spill]] %s6159_s20 }
  0x37   :  { %6938 = sst [smem:[#allocation30_spill]] %s6164_s27 }
  0x38   :  { %6939 = sst [smem:[#allocation31_spill]] %s6169_s4 }
  0x39   :  { %s6174_s12 = sld [smem:[%s6886_s0 + %s6025_s7]]   ;;  %s6029_s7 = smov 30  }
  0x3a   :  { %s6179_s20 = sld [smem:[%s6886_s0 + %s6026_s15]]   ;;  %s6030_s15 = smov 31  }
  0x3b   :  { %s6184_s27 = sld [smem:[%s6886_s0 + %s6027_s22]]   ;;  %s6031_s22 = smov 32  }
  0x3c   :  { %s6189_s4 = sld [smem:[%s6886_s0 + %s6028_s28]]  }
  0x3f   :  { %6940 = sst [smem:[#allocation32_spill]] %s6174_s12 }
  0x40   :  { %6941 = sst [smem:[#allocation33_spill]] %s6179_s20 }
  0x41   :  { %6942 = sst [smem:[#allocation34_spill]] %s6184_s27 }
  0x42   :  { %s6194_s12 = sld [smem:[%s6886_s0 + %s6029_s7]]  }
  0x43   :  { %s6199_s20 = sld [smem:[%s6886_s0 + %s6030_s15]]  }
  0x44   :  { %s6204_s27 = sld [smem:[%s6886_s0 + %s6031_s22]]  }
  0x48   :  { %6943 = sst [smem:[#allocation35_spill]] %s6194_s12 }
  0x49   :  { %6944 = sst [smem:[#allocation36_spill]] %s6199_s20 }
  0x4a   :  { %6945 = sst [smem:[#allocation37_spill]] %s6204_s27 }
  0x4b   :  { %70 = vsyncpa [#allocation4], 0 }
  0x4c   :  { %72 = vsyncpa [#allocation4 + $0x1], 0  ;;  %s6206_s28 = smov 0   ;;  %s6208_s1 = smov 0  }
  0x4d   :  { %s6210_s2 = smov 0   ;;  %s6212_s7 = smov 0  }
  0x4e   :  { %s6214_s10 = smov 0   ;;  %s6216_s11 = smov 0  }
  0x4f   :  { %s6218_s15 = smov 0   ;;  %s6220_s16 = smov 0  }
  0x50 LB: > { %6946 = sst [smem:[#allocation38_spill]] %s5970_s28  ;;  %s5030_s0 = sadd.s32 4294967295, %s5998_s16   ;;  %s5998_s16 = sphi %s6220_s16, %s78_s16   ;;  %s5994_s15 = sphi %s6218_s15, %s7058_s15   ;;  %s5990_s11 = sphi %s6216_s11, %s7057_s11   ;;  %s5986_s10 = sphi %s6214_s10, %s7056_s10   ;;  %s5982_s7 = sphi %s6212_s7, %s7055_s7   ;;  %s5978_s2 = sphi %s6210_s2, %s7054_s2   ;;  %s5974_s1 = sphi %s6208_s1, %s7053_s1   ;;  %s5970_s28 = sphi %s6206_s28, %s7052_s28  }
  0x51   : > { %6947 = sst [smem:[#allocation39_spill]] %s5974_s1  ;;  %s5031_s18 = sadd.s32 4294967294, %s5998_s16  }
  0x52   : > { %6948 = sst [smem:[#allocation40_spill]] %s5978_s2  ;;  %s87_s22 = sadd.s32 1, %s5990_s11 }
  0x53   : > { %6949 = sst [smem:[#allocation41_spill]] %s5982_s7  ;;  %p88_p0 = scmp.ge.s32.totalorder %s87_s22, 2 }
  0x54   : > { %6950 = sst [smem:[#allocation42_spill]] %s5986_s10  ;;  %s90_s23 = sadd.s32 1, %s5994_s15 }
  0x55   : > { %6951 = sst [smem:[#allocation43_spill]] %s5990_s11  ;;  %p929_p1 = scmp.ne.s32.totalorder %s5978_s2, %s5974_s1 }
  0x56   : > { %6952 = sst [smem:[#allocation44_spill]] %s5994_s15  ;;  %p930_p2 = scmp.eq.s32.totalorder %s5030_s0, 3 }
  0x57   : > { %6953 = sst [smem:[#allocation45_spill]] %s5998_s16  ;;  %s7060_s22 = smov (%p88_p0, %s87_s22), 0 }
  0x58   : > { %6954 = sst [smem:[#allocation46_spill]] %s7060_s22  ;;  %s7062_s23 = smov (!%p88_p0, %s90_s23), %s5994_s15 }
  0x59   : > { %p6255_p3 = por %p930_p2, %p929_p1  ;;  %p935_p4 = scmp.ne.s32.totalorder %s5974_s1, %s5970_s28 }
  0x5a   : > { %p92_p5 = scmp.ge.s32.totalorder %s7062_s23, 2  ;;  %p936_p6 = scmp.eq.s32.totalorder %s5031_s18, 3 }
  0x5b   : > { %s6955_s26 = scalar_select %p6255_p3, 1, 0 }
  0x5c   : > { %p5034_p7 = scmp.ge.s32.totalorder %s5998_s16, 1  ;;  %p1170_p8 = scmp.lt.s32.totalorder %s5998_s16, 5 }
  0x5d   : > { %6956 = sst [smem:[#allocation47_spill]] %s6955_s26  ;;  %s7064_s23 = smov (%p92_p5, %s7062_s23), 0 }
  0x5e   : > { %6957 = sst [smem:[#allocation48_spill]] %s7064_s23  ;;  %p6265_p9 = por %p936_p6, %p935_p4 }
  0x5f   : > { %p1171_p10 = pnand %p5034_p7, %p1170_p8  ;;  %s916_s0 = ssub.s32 %s5994_s15, %s7064_s23 }
  0x60   : > { %s6958_s11 = scalar_select %p6265_p9, 1, 0 }
  0x61   : > { %s919_s22 = sadd.s32 1, %s5978_s2  ;;  %p917_p11 = scmp.eq.s32.totalorder %s916_s0, 0 }
  0x62   : > { %6959 = sst [smem:[#allocation49_spill]] %s6958_s11  ;;  %1174 = sbr.rel (%p1171_p10) target bundleno = 4110 (0x100e), region = 148 }
  0x63   : > { %s6273_s27 = scalar_select %p917_p11, %s5978_s2, %s919_s22  }
  0x65   : > { %6960 = sst [smem:[#allocation50_spill]] %s6273_s27 }
  0x67   : > { %s6961_s5 = sld [smem:[#allocation6_spill]]  ;;  %s6892_s18 = sand.u32 1, %s5974_s1  }
  0x68   : > { %s6962_s9 = sld [smem:[#allocation7_spill]]  ;;  %p1367_p12 = scmp.lt.s32.totalorder %s5986_s10, 1 }
  0x69   : > { %s6963_s13 = sld [smem:[#allocation8_spill]]  ;;  %s6279_s22 = sshll.u32 %s6892_s18, 3 }
  0x6a   : > { %s6964_s17 = sld [smem:[#allocation9_spill]]  ;;  %p1383_p13 = scmp.lt.s32.totalorder %s5982_s7, 1 }
  0x6b   : > { %s6965_s21 = sld [smem:[#allocation10_spill]] }
  0x6c   : > { %s6966_s25 = sld [smem:[#allocation11_spill]] }
  0x6d   : > { %s6967_s29 = sld [smem:[#allocation12_spill]] }
  0x6e   : > { %s6968_s3 = sld [smem:[#allocation13_spill]] }
  0x6f   : > { %6969 = sst [smem:[#allocation51_spill]] %s6279_s22 }
  0x70   : > { %s6970_s8 = sld [smem:[#allocation14_spill]] }
  0x71   : > { %s6971_s14 = sld [smem:[#allocation15_spill]] }
  0x72   : > { %s1368_s0 = scalar_select %p1367_p12, %s5986_s10, 1 }
  0x73   : > { %s6284_s23 = scalar_select %p1383_p13, %s5982_s7, 1 }
  0x74   : > { %s5036_s15 = sshll.u32 %s1368_s0, 3  ;;  %s6973_s19 = sld [smem:[#allocation16_spill]] }
  0x75   : > { %s5038_s27 = sshll.u32 %s1368_s0, 2  ;;  %s6974_s30 = sld [smem:[#allocation18_spill]] }
  0x76   : > { %s6287_s2 = scalar_lea.vmem %s6961_s5, %s5036_s15  ;;  %s6976_s6 = sld [smem:[#allocation19_spill]] }
  0x77   : > { %6975 = sst [smem:[#allocation52_spill]] %s6287_s2  ;;  %s6290_s18 = scalar_lea.vmem %s6962_s9, %s5036_s15 }
  0x78   : > { %6977 = sst [smem:[#allocation53_spill]] %s6290_s18  ;;  %s6293_s28 = scalar_lea.vmem %s6963_s13, %s5038_s27 }
  0x79   : > { %s6978_s11 = sld [smem:[#allocation20_spill]]  ;;  %s6296_s26 = scalar_lea.vmem %s6964_s17, %s5038_s27 }
  0x7a   : > { %6979 = sst [smem:[#allocation54_spill]] %s6293_s28  ;;  %s5212_s10 = sshll.u32 %s6284_s23, 6 }
  0x7b   : > { %s6980_s16 = sld [smem:[#allocation21_spill]]  ;;  %s5042_s12 = sshll.u32 %s6284_s23, 2 }
  0x7c   : > { %6981 = sst [smem:[#allocation55_spill]] %s6296_s26  ;;  %s6301_s22 = scalar_lea.vmem %s6965_s21, %s5212_s10 }
  0x7d   : > { %s6982_s1 = sld [smem:[#allocation22_spill]]  ;;  %s6304_s5 = scalar_lea.vmem %s6966_s25, %s5042_s12 }
  0x7e   : > { %s6983_s20 = sld [smem:[#allocation23_spill]]  ;;  %s6307_s15 = scalar_lea.vmem %s6967_s29, %s5212_s10 }
  0x7f   : > { %s6984_s7 = sld [smem:[#allocation24_spill]]  ;;  %s6310_s13 = scalar_lea.vmem %s6968_s3, %s5042_s12 }
  0x80   : > { %6985 = sst [smem:[#allocation56_spill]] %s6301_s22  ;;  %s6313_s27 = scalar_lea.vmem %s6970_s8, %s5212_s10 }
  0x81   : > { %s6986_s0 = sld [smem:[#allocation25_spill]]  ;;  %s6316_s26 = scalar_lea.vmem %s6971_s14, %s5042_s12 }
  0x82   : > { %6987 = sst [smem:[#allocation57_spill]] %s6304_s5  ;;  %s5215_s18 = sshll.u32 %s6284_s23, 4 }
  0x83   : > { %s6988_s2 = sld [smem:[#allocation26_spill]]  ;;  %s6322_s29 = scalar_lea.vmem %s6973_s19, %s5215_s18 }
  0x84   : > { %6989 = sst [smem:[#allocation58_spill]] %s6307_s15  ;;  %s6325_s3 = scalar_lea.vmem %s6974_s30, %s5212_s10 }
  0x85   : > { %s6990_s9 = sld [smem:[#allocation27_spill]]  ;;  %s6337_s24 = scalar_lea.vmem %s6982_s1, %s5212_s10 }
  0x86   : > { %6991 = sst [smem:[#allocation59_spill]] %s6310_s13  ;;  %s6328_s13 = scalar_lea.vmem %s6976_s6, %s5042_s12 }
  0x87   : > { %6992 = sst [smem:[#allocation60_spill]] %s6313_s27  ;;  %s6334_s27 = scalar_lea.vmem %s6980_s16, %s5042_s12 }
  0x88   : > { %s6993_s17 = sld [smem:[#allocation28_spill]]  ;;  %s6340_s19 = scalar_lea.vmem %s6983_s20, %s5042_s12 }
  0x89   : > { %6994 = sst [smem:[#allocation61_spill]] %s6316_s26  ;;  %s6331_s26 = scalar_lea.vmem %s6978_s11, %s5212_s10 }
  0x8a   : > { %s6995_s21 = sld [smem:[#allocation29_spill]]  ;;  %s1452_s30 = scalar_lea.vmem %s6986_s0, %s6284_s23 }
  0x8b   : > { %s6996_s28 = sld [smem:[#allocation30_spill]]  ;;  %s1460_s6 = scalar_lea.vmem %s6990_s9, %s6284_s23 }
  0x8c   : > { %s6997_s5 = sld [smem:[#allocation31_spill]] }
  0x8d   : > { %6998 = sst [smem:[#allocation62_spill]] %s6322_s29  ;;  %s6343_s29 = scalar_lea.vmem %s6984_s7, %s5215_s18 }
  0x8e   : > { %s6999_s15 = sld [smem:[#allocation32_spill]] }
  0x8f   : > { %7000 = sst [smem:[#allocation63_spill]] %s6325_s3  ;;  %s6348_s3 = scalar_lea.vmem %s6988_s2, %s5215_s18 }
  0x90   : > { %s7001_s8 = sld [smem:[#allocation33_spill]]  ;;  %s1468_s11 = scalar_lea.vmem %s6995_s21, %s6284_s23 }
  0x91   : > { %7002 = sst [smem:[#allocation64_spill]] %s6328_s13  ;;  %s5221_s13 = sshll.u32 %s6284_s23, 5 }
  0x92   : > { %s7003_s14 = sld [smem:[#allocation34_spill]]  ;;  %s6354_s22 = scalar_lea.vmem %s6993_s17, %s5221_s13 }
  0x93   : > { %7004 = sst [smem:[#allocation65_spill]] %s6331_s26  ;;  %s1471_s26 = scalar_lea.vmem %s6996_s28, %s6284_s23 }
  0x94   : > { %7005 = sst [smem:[#allocation66_spill]] %s6334_s27  ;;  %s1474_s16 = scalar_lea.vmem %s6997_s5, %s6284_s23 }
  0x95   : > { %s7006_s25 = sld [smem:[#allocation51_spill]]  ;;  %s1477_s27 = scalar_lea.vmem %s6999_s15, %s6284_s23 }
  0x96   : > { %7007 = sst [smem:[#allocation67_spill]] %s6337_s24  ;;  %s1480_s1 = scalar_lea.vmem %s7001_s8, %s6284_s23 }
  0x97   : > { %s1486_s24 = scalar_lea.vmem %s6189_s4, %s6284_s23  ;;  %s7008_s20 = sld [smem:[#allocation41_spill]] }
  0x98   : > { %s1483_s10 = scalar_lea.vmem %s7003_s14, %s6284_s23 }
  0x9b   : > { %s1366_s12 = scalar_lea.vmem [#allocation3], %s7006_s25 }
  0x9d   : > { %p5066_p0 = scmp.ne.s32.totalorder %s7008_s20, 0 }
  0x9e   : > { %s7009_s7 = sld [smem:[#allocation52_spill]] (!%p5066_p0) }
  0x9f   : > { %1493 = sbr.rel (%p5066_p0) target bundleno = 166 (0xa6), region = 152 }
  0xa4   : > { %v1494_v0 = vld [vmem:[%s7009_s7] sm:$0xff]  ;;  %vm1495_vm0 = vcmask 261120  }
  0xa5   : > { %1496 = vst.msk [vmem:[#allocation2] sm:$0xff] %vm1495_vm0, %v1494_v0 }
  0xa6 PF: > { %s7010_s9 = sld [smem:[#allocation56_spill]]  ;;  %v6032_v2 = vmov 0.0   ;;  %vm6033_vm1 = vmmov 0   ;;  %vm1603_vm2 = vcmask 261120   ;;  %vm2275_vm3 = vcmask 64512  }
  0xa7   : > { %5350 = vmatprep.subr.bf16.mxu0 %v6032_v2  ;;  %5358 = vmatprep.subr.bf16.mxu1 %v6032_v2  ;;  %s7011_s5 = sld [smem:[#allocation58_spill]]  ;;  %vm2525_vm4 = vcmask 1043456   ;;  %vm4487_vm9 = vcmask 523264  }
  0xa8   : > { %5354 = vmatprep.mubr.msk.bf16.mxu0 %vm6033_vm1, %v6032_v2  ;;  %5362 = vmatprep.mubr.msk.bf16.mxu1 %vm6033_vm1, %v6032_v2  ;;  %s7012_s13 = sld [smem:[#allocation60_spill]] }
  0xa9   : > { %s7013_s17 = sld [smem:[#allocation59_spill]] }
  0xaa   : > { %s7014_s21 = sld [smem:[#allocation57_spill]] }
  0xab   : > { %s7015_s25 = sld [smem:[#allocation61_spill]] }
  0xac   : > { %v5812_v1 = vld [vmem:[%s7010_s9 + $0x8] sm:$0xff]   ;;  %v5813_v3 = vld [vmem:[%s7010_s9 + $0x18] sm:$0xff]   ;;  %v5814_v4 = vld [vmem:[%s7010_s9] sm:$0xff]   ;;  %s7016_s8 = sld [smem:[#allocation54_spill]] }
  0xad   : > { %5351 = vmatpush3.bf16.msra.mxu0 %v5812_v1  ;;  %5359 = vmatpush3.bf16.msra.mxu1 %v5813_v3  ;;  %v5815_v5 = vld [vmem:[%s7010_s9 + $0x10] sm:$0xff]   ;;  %v6385_v6 = vld [vmem:[#allocation2] sm:$0xff]  ;;  %v5816_v8 = vld [vmem:[%s7010_s9 + $0x28] sm:$0xff]   ;;  %s7019_s14 = sld [smem:[#allocation62_spill]] }
  0xae   : > { %5352 = vmatprep.subr.bf16.mxu0 %v6032_v2  ;;  %5360 = vmatprep.subr.bf16.mxu1 %v6032_v2  ;;  %v6389_v7 = vpack.c.bf16 %v6385_v6, %v6385_v6  ;;  %v5817_v9 = vld [vmem:[%s7010_s9 + $0x38] sm:$0xff]   ;;  %v5818_v10 = vld [vmem:[%s7010_s9 + $0x20] sm:$0xff]   ;;  %v5819_v11 = vld [vmem:[%s7010_s9 + $0x30] sm:$0xff]   ;;  %s7020_s28 = sld [smem:[#allocation17_spill]] }
  0xaf   : > { %v5820_v12 = vld [vmem:[%s7011_s5 + $0x8] sm:$0xff]   ;;  %v5821_v13 = vld [vmem:[%s7011_s5 + $0x18] sm:$0xff]   ;;  %v5822_v14 = vld [vmem:[%s7011_s5] sm:$0xff]   ;;  %s7022_s18 = sld [smem:[#allocation63_spill]] }
  0xb0   : > { %v5823_v15 = vld [vmem:[%s7011_s5 + $0x10] sm:$0xff]   ;;  %v5824_v16 = vld [vmem:[%s7011_s5 + $0x28] sm:$0xff]   ;;  %v5825_v17 = vld [vmem:[%s7011_s5 + $0x38] sm:$0xff]   ;;  %s7025_s20 = sld [smem:[#allocation65_spill]] }
  0xb1   : > { %5353 = vmatpush3.bf16.msra.mxu0 %v5814_v4  ;;  %5361 = vmatpush3.bf16.msra.mxu1 %v5815_v5  ;;  %v5826_v18 = vld [vmem:[%s7011_s5 + $0x20] sm:$0xff]   ;;  %v5827_v19 = vld [vmem:[%s7011_s5 + $0x30] sm:$0xff]   ;;  %v5828_v20 = vld [vmem:[%s7012_s13 + $0x8] sm:$0xff]   ;;  %s7028_s7 = sld [smem:[#allocation66_spill]] }
  0xb2   : > { %5366 = vmatprep.subr.bf16.mxu0 %v6032_v2  ;;  %5374 = vmatprep.subr.bf16.mxu1 %v6032_v2  ;;  %v5829_v21 = vld [vmem:[%s7012_s13] sm:$0xff]   ;;  %v5830_v22 = vld [vmem:[%s7012_s13 + $0x18] sm:$0xff]   ;;  %v5831_v23 = vld [vmem:[%s7012_s13 + $0x10] sm:$0xff]   ;;  %s7029_s9 = sld [smem:[#allocation64_spill]] }
  0xb3   : > { %v5832_v24 = vld [vmem:[%s7012_s13 + $0x28] sm:$0xff]   ;;  %v5833_v25 = vld [vmem:[%s7012_s13 + $0x20] sm:$0xff]   ;;  %v5834_v26 = vld [vmem:[%s7012_s13 + $0x38] sm:$0xff]   ;;  %s7030_s5 = sld [smem:[#allocation55_spill]] }
  0xb4   : > { %5355 = vmatmul.mubr.msk.bf16.vlgmr.msra.gmra.mxu0 %vm1603_vm2, %v6389_v7  ;;  %5363 = vmatmul.mubr.msk.bf16.vlgmr.msra.gmra.mxu1 %vm1603_vm2, %v6389_v7  ;;  %v5835_v27 = vld [vmem:[%s7012_s13 + $0x30] sm:$0xff]   ;;  %v5083_v43 = vld [vmem:[%s7013_s17] ss:$0 sm:$0xff]  ;;  %v5084_v45 = vld [vmem:[%s7013_s17 + $0x1] ss:$0 sm:$0xff]  ;;  %s7021_s2 = scalar_lea.vmem %s7020_s28, %s6284_s23 }
  0xb5   : > { %5367 = vmatpush3.bf16.msra.mxu0 %v5816_v8  ;;  %5375 = vmatpush3.bf16.msra.mxu1 %v5817_v9  ;;  %v5067_v53 = vld [vmem:[%s7014_s21] ss:$0 sm:$0xff]  ;;  %v5068_v56 = vld [vmem:[%s7014_s21 + $0x1] ss:$0 sm:$0xff]  ;;  %v5085_v61 = vld [vmem:[%s7013_s17 + $0x2] ss:$0 sm:$0xff] }
  0xb6   : > { %5368 = vmatprep.subr.bf16.mxu0 %v6032_v2  ;;  %5376 = vmatprep.subr.bf16.mxu1 %v6032_v2  ;;  %v5086_v0 = vld [vmem:[%s7013_s17 + $0x3] ss:$0 sm:$0xff] }
  0xb7   : > { %5370 = vmatprep.mubr.msk.bf16.mxu0 %vm6033_vm1, %v6032_v2  ;;  %5378 = vmatprep.mubr.msk.bf16.mxu1 %vm6033_vm1, %v6032_v2 }
  0xb9   : > { %5369 = vmatpush3.bf16.msra.mxu0 %v5818_v10  ;;  %5377 = vmatpush3.bf16.msra.mxu1 %v5819_v11 }
  0xba   : > { %5382 = vmatprep.subr.bf16.mxu0 %v6032_v2  ;;  %5390 = vmatprep.subr.bf16.mxu1 %v6032_v2 }
  0xbc   : > { %5371 = vmatmul.mubr.msk.bf16.vlgmr.msra.gmra.mxu0 %vm1603_vm2, %v6389_v7  ;;  %5379 = vmatmul.mubr.msk.bf16.vlgmr.msra.gmra.mxu1 %vm1603_vm2, %v6389_v7 }
  0xbd   : > { %5383 = vmatpush3.bf16.msra.mxu0 %v5820_v12  ;;  %5391 = vmatpush3.bf16.msra.mxu1 %v5821_v13  ;;  %v5069_v13 = vld [vmem:[%s7014_s21 + $0x2] ss:$0 sm:$0xff] }
  0xbe   : > { %5384 = vmatprep.subr.bf16.mxu0 %v6032_v2  ;;  %5392 = vmatprep.subr.bf16.mxu1 %v6032_v2 }
  0xbf   : > { %5386 = vmatprep.mubr.msk.bf16.mxu0 %vm6033_vm1, %v6032_v2  ;;  %5394 = vmatprep.mubr.msk.bf16.mxu1 %vm6033_vm1, %v6032_v2 }
  0xc1   : > { %5385 = vmatpush3.bf16.msra.mxu0 %v5822_v14  ;;  %5393 = vmatpush3.bf16.msra.mxu1 %v5823_v15 }
  0xc2   : > { %5398 = vmatprep.subr.bf16.mxu0 %v6032_v2  ;;  %5406 = vmatprep.subr.bf16.mxu1 %v6032_v2 }
  0xc4   : > { %5387 = vmatmul.mubr.msk.bf16.vlgmr.msra.gmra.mxu0 %vm1603_vm2, %v6389_v7  ;;  %5395 = vmatmul.mubr.msk.bf16.vlgmr.msra.gmra.mxu1 %vm1603_vm2, %v6389_v7 }
  0xc5   : > { %5399 = vmatpush3.bf16.msra.mxu0 %v5824_v16  ;;  %5407 = vmatpush3.bf16.msra.mxu1 %v5825_v17  ;;  %v5070_v16 = vld [vmem:[%s7014_s21 + $0x3] ss:$0 sm:$0xff] }
  0xc6   : > { %5400 = vmatprep.subr.bf16.mxu0 %v6032_v2  ;;  %5408 = vmatprep.subr.bf16.mxu1 %v6032_v2 }
  0xc7   : > { %5402 = vmatprep.mubr.msk.bf16.mxu0 %vm6033_vm1, %v6032_v2  ;;  %5410 = vmatprep.mubr.msk.bf16.mxu1 %vm6033_vm1, %v6032_v2 }
  0xc9   : > { %5401 = vmatpush3.bf16.msra.mxu0 %v5826_v18  ;;  %5409 = vmatpush3.bf16.msra.mxu1 %v5827_v19 }
  0xca   : > { %5414 = vmatprep.subr.bf16.mxu0 %v6032_v2  ;;  %5422 = vmatprep.subr.bf16.mxu1 %v6032_v2 }
  0xcc   : > { %5403 = vmatmul.mubr.msk.bf16.vlgmr.msra.gmra.mxu0 %vm1603_vm2, %v6389_v7  ;;  %5411 = vmatmul.mubr.msk.bf16.vlgmr.msra.gmra.mxu1 %vm1603_vm2, %v6389_v7 }
  0xcd   : > { %5418 = vmatprep.mubr.msk.bf16.mxu0 %vm6033_vm1, %v6032_v2  ;;  %5426 = vmatprep.mubr.msk.bf16.mxu1 %vm6033_vm1, %v6032_v2 }
  0xce   : > { %5415 = vmatpush3.bf16.msra.mxu0 %v5828_v20  ;;  %5423 = vmatpush3.bf16.msra.mxu1 %v5830_v22 }
  0xcf   : > { %5416 = vmatprep.subr.bf16.mxu0 %v6032_v2  ;;  %5424 = vmatprep.subr.bf16.mxu1 %v6032_v2 }
  0xd2   : > { %5417 = vmatpush3.bf16.msra.mxu0 %v5829_v21  ;;  %5425 = vmatpush3.bf16.msra.mxu1 %v5831_v23 }
  0xd3   : > { %5430 = vmatprep.subr.bf16.mxu0 %v6032_v2  ;;  %5438 = vmatprep.subr.bf16.mxu1 %v6032_v2 }
  0xd5   : > { %5419 = vmatmul.mubr.msk.bf16.vlgmr.msra.gmra.mxu0 %vm1603_vm2, %v6389_v7  ;;  %5427 = vmatmul.mubr.msk.bf16.vlgmr.msra.gmra.mxu1 %vm1603_vm2, %v6389_v7 }
  0xd6   : > { %5431 = vmatpush3.bf16.msra.mxu0 %v5832_v24  ;;  %5434 = vmatprep.mubr.msk.bf16.mxu0 %vm6033_vm1, %v6032_v2 }
  0xd7   : > { %5432 = vmatprep.subr.bf16.mxu0 %v6032_v2  ;;  %5439 = vmatpush3.bf16.msra.mxu1 %v5834_v26  ;;  %v5099_v26 = vld [vmem:[%s7015_s25] ss:$0 sm:$0xff] }
  0xd8   : > { %5440 = vmatprep.subr.bf16.mxu1 %v6032_v2  ;;  %5442 = vmatprep.mubr.msk.bf16.mxu1 %vm6033_vm1, %v6032_v2 }
  0xda   : > { %5433 = vmatpush3.bf16.msra.mxu0 %v5833_v25 }
  0xdb   : > { %5446 = vmatprep.subr.bf16.mxu0 %v6032_v2  ;;  %5441 = vmatpush3.bf16.msra.mxu1 %v5835_v27 }
  0xdc   : > { %5452 = vmatprep.subr.bf16.mxu1 %v6032_v2 }
  0xdd   : > { %5435 = vmatmul.mubr.msk.bf16.vlgmr.msra.gmra.mxu0 %vm1603_vm2, %v6389_v7 }
  0xde   : > { %5448 = vmatprep.mubr.msk.bf16.mxu0 %vm6033_vm1, %v6032_v2  ;;  %5443 = vmatmul.mubr.msk.bf16.vlgmr.msra.gmra.mxu1 %vm1603_vm2, %v6389_v7 }
  0xdf   : > { %5454 = vmatprep.mubr.msk.bf16.mxu1 %vm6033_vm1, %v6032_v2 }
 0x174   : > { %v1641_v28 = vpop.f32.mrf.mxu0  ;;  %v1693_v29 = vpop.f32.mrf.mxu1 }
 0x175   : > { %v1642_v62 = vadd.f32 %v5067_v53, %v1641_v28  ;;  %v1694_v1 = vadd.f32 %v5068_v56, %v1693_v29 }
 0x176   : > { %v5356_v30 = vpop.f32.mrf.mxu0  ;;  %v5364_v31 = vpop.f32.mrf.mxu1 }
 0x177   : > { %v2267_v9 = vpack.c.bf16 %v1642_v62, %v1642_v62  ;;  %v2268_v12 = vpack.c.bf16 %v1694_v1, %v1694_v1  ;;  %v5100_v30 = vld [vmem:[%s7015_s25 + $0x1] ss:$0 sm:$0xff] }
 0x178   : > { %v1644_v32 = vpop.f32.mrf.mxu0  ;;  %v1696_v33 = vpop.f32.mrf.mxu1 }
 0x17a   : > { %v5357_v34 = vpop.f32.mrf.mxu0  ;;  %v5365_v35 = vpop.f32.mrf.mxu1 }
 0x17c   : > { %v1745_v36 = vpop.f32.mrf.mxu0  ;;  %v1797_v37 = vpop.f32.mrf.mxu1 }
 0x17d   : > { %v1746_v21 = vadd.f32 %v5069_v13, %v1745_v36  ;;  %v1798_v23 = vadd.f32 %v5070_v16, %v1797_v37 }
 0x17e   : > { %v5372_v38 = vpop.f32.mrf.mxu0  ;;  %v5380_v39 = vpop.f32.mrf.mxu1 }
 0x17f   : > { %v2269_v24 = vpack.c.bf16 %v1746_v21, %v1746_v21  ;;  %v2270_v25 = vpack.c.bf16 %v1798_v23, %v1798_v23 }
 0x180   : > { %v1748_v40 = vpop.f32.mrf.mxu0  ;;  %v1800_v41 = vpop.f32.mrf.mxu1 }
 0x182   : > { %v5373_v42 = vpop.f32.mrf.mxu0  ;;  %v5381_v44 = vpop.f32.mrf.mxu1 }
 0x184   : > { %v1873_v46 = vpop.f32.mrf.mxu0  ;;  %v1925_v48 = vpop.f32.mrf.mxu1 }
 0x185   : > { %v1874_v47 = vadd.f32 %v5083_v43, %v1873_v46  ;;  %v1926_v49 = vadd.f32 %v5084_v45, %v1925_v48 }
 0x186   : > { %v5388_v50 = vpop.f32.mrf.mxu0  ;;  %v5396_v52 = vpop.f32.mrf.mxu1 }
 0x187   : > { %v2271_v51 = vpack.c.bf16 %v1874_v47, %v1874_v47  ;;  %v2272_v54 = vpack.c.bf16 %v1926_v49, %v1926_v49  ;;  %v1499_v50 = vld [vmem:[%s7016_s8] sm:$0xf] }
 0x188   : > { %v1876_v55 = vpop.f32.mrf.mxu0  ;;  %v1928_v58 = vpop.f32.mrf.mxu1  ;;  %vm2460_vm5 = vcmp.eq.bf16.partialorder %v1499_v50, 0 }
 0x189   : > { %v2280_v57 = vsel %vm2275_vm3, %v2271_v51, 0  ;;  %v2326_v59 = vsel %vm2275_vm3, %v2272_v54, 0  ;;  %v6034_v51 = vmov 0  }
 0x18a   : > { %v5389_v60 = vpop.f32.mrf.mxu0  ;;  %5447 = vmatpush3.bf16.xpose.msra.mxu0 %v2280_v57  ;;  %v5397_v63 = vpop.f32.mrf.mxu1  ;;  %5453 = vmatpush3.bf16.xpose.msra.mxu1 %v2326_v59  ;;  %v2461_v52 = vsel %vm2460_vm5, 65537, %v6034_v51 }
 0x18b   : > { %5458 = vmatprep.subr.bf16.mxu0 %v6032_v2  ;;  %5464 = vmatprep.subr.bf16.mxu1 %v6032_v2  ;;  %v2462_v53 = vunpack.c.l.b16 %v2461_v52 }
 0x18c   : > { %v1977_v3 = vpop.f32.mrf.mxu0  ;;  %v2029_v5 = vpop.f32.mrf.mxu1 }
 0x18d   : > { %v1978_v4 = vadd.f32 %v5085_v61, %v1977_v3  ;;  %v2030_v7 = vadd.f32 %v5086_v0, %v2029_v5  ;;  %vm6521_vm6 = vcmp.ne.s32.totalorder %v2462_v53, 0 }
 0x18e   : > { %v5404_v8 = vpop.f32.mrf.mxu0  ;;  %v5412_v11 = vpop.f32.mrf.mxu1 }
 0x18f   : > { %v2273_v10 = vpack.c.bf16 %v1978_v4, %v1978_v4  ;;  %v2274_v14 = vpack.c.bf16 %v2030_v7, %v2030_v7 }
 0x190   : > { %v1980_v15 = vpop.f32.mrf.mxu0  ;;  %v2032_v18 = vpop.f32.mrf.mxu1 }
 0x191   : > { %v2372_v17 = vsel %vm2275_vm3, %v2273_v10, 0  ;;  %5449 = vmatmul.mubr.msk.bf16.vlgmr.msra.gmra.mxu0 %vm2275_vm3, %v2267_v9  ;;  %v2418_v19 = vsel %vm2275_vm3, %v2274_v14, 0  ;;  %5455 = vmatmul.mubr.msk.bf16.vlgmr.msra.gmra.mxu1 %vm2275_vm3, %v2268_v12 }
 0x192   : > { %v5405_v20 = vpop.f32.mrf.mxu0  ;;  %5459 = vmatpush3.bf16.xpose.msra.mxu0 %v2372_v17  ;;  %v5413_v22 = vpop.f32.mrf.mxu1  ;;  %5465 = vmatpush3.bf16.xpose.msra.mxu1 %v2418_v19 }
 0x193   : > { %5460 = vmatprep.mubr.msk.bf16.mxu0 %vm6033_vm1, %v6032_v2  ;;  %5466 = vmatprep.mubr.msk.bf16.mxu1 %vm6033_vm1, %v6032_v2 }
 0x194   : > { %5470 = vmatprep.subr.bf16.mxu0 %v6032_v2  ;;  %5476 = vmatprep.subr.bf16.mxu1 %v6032_v2 }
 0x195   : > { %v2105_v27 = vpop.f32.mrf.mxu0  ;;  %v2157_v33 = vpop.f32.mrf.mxu1 }
 0x196   : > { %v2106_v28 = vadd.f32 %v5099_v26, %v2105_v27  ;;  %v2158_v35 = vadd.f32 %v5100_v30, %v2157_v33 }
 0x197   : > { %v5420_v29 = vpop.f32.mrf.mxu0  ;;  %v5428_v37 = vpop.f32.mrf.mxu1 }
 0x198   : > { %v2518_v31 = vpack.c.bf16 %v2106_v28, %v2106_v28  ;;  %v2519_v38 = vpack.c.bf16 %v2158_v35, %v2158_v35 }
 0x199   : > { %5461 = vmatmul.mubr.msk.bf16.vlgmr.msra.gmra.mxu0 %vm2275_vm3, %v2269_v24  ;;  %5467 = vmatmul.mubr.msk.bf16.vlgmr.msra.gmra.mxu1 %vm2275_vm3, %v2270_v25  ;;  %v2108_v32 = vpop.f32.mrf.mxu0  ;;  %v2160_v39 = vpop.f32.mrf.mxu1 }
 0x19a   : > { %5472 = vmatprep.mubr.msk.bf16.mxu0 %vm6033_vm1, %v6032_v2  ;;  %5478 = vmatprep.mubr.msk.bf16.mxu1 %vm6033_vm1, %v6032_v2  ;;  %v2527_v34 = vsel %vm2525_vm4, %v2518_v31, 0  ;;  %v2573_v41 = vsel %vm2525_vm4, %v2519_v38, 0  ;;  %v5101_v39 = vld [vmem:[%s7015_s25 + $0x2] ss:$0 sm:$0xff] }
 0x19b   : > { %v5421_v36 = vpop.f32.mrf.mxu0  ;;  %5471 = vmatpush3.bf16.msra.mxu0 %v2527_v34  ;;  %v5429_v42 = vpop.f32.mrf.mxu1  ;;  %5477 = vmatpush3.bf16.msra.mxu1 %v2573_v41 }
 0x19c   : > { %5482 = vmatprep.subr.bf16.mxu0 %v6032_v2  ;;  %5488 = vmatprep.subr.bf16.mxu1 %v6032_v2 }
 0x19d   : > { %v6513_v40 = vpop.f32.mrf.mxu0 }
 0x19e   : > { %v6517_v45 = vpop.f32.mrf.mxu1  ;;  %v2210_v42 = vadd.f32 %v5101_v39, %v6513_v40 }
 0x19f   : > { %v5436_v43 = vpop.f32.mrf.mxu0 }
 0x1a0   : > { %v5444_v47 = vpop.f32.mrf.mxu1  ;;  %v5102_v43 = vld [vmem:[%s7015_s25 + $0x3] ss:$0 sm:$0xff] }
 0x1a1   : > { %v2212_v44 = vpop.f32.mrf.mxu0  ;;  %v2520_v47 = vpack.c.bf16 %v2210_v42, %v2210_v42 }
 0x1a2   : > { %v2264_v48 = vpop.f32.mrf.mxu1 }
 0x1a3   : > { %v5437_v46 = vpop.f32.mrf.mxu0  ;;  %v2262_v48 = vadd.f32 %v5102_v43, %v6517_v45  ;;  %v2619_v53 = vsel %vm2525_vm4, %v2520_v47, 0  ;;  %v5127_v47 = vld [vmem:[%s7021_s2] ss:$0 sm:$0xff] }
 0x1a4   : > { %v5445_v49 = vpop.f32.mrf.mxu1 }
 0x1a5   : > { %v2521_v54 = vpack.c.bf16 %v2262_v48, %v2262_v48 }
 0x1a7   : > { %v2665_v45 = vsel %vm2525_vm4, %v2521_v54, 0 }
 0x251   : > { %v2316_v55 = vpop.f32.mrf.mxu0  ;;  %v2362_v57 = vpop.f32.mrf.mxu1 }
 0x252   : > { %v2466_v56 = vsel %vm6521_vm6, -1e+09, %v2316_v55  ;;  %v2467_v60 = vsel %vm6521_vm6, -1e+09, %v2362_v57  ;;  %v1561_v57 = vld [vmem:[%s7019_s14] sm:$0xf] }
 0x253   : > { %v5450_v58 = vpop.f32.mrf.mxu0  ;;  %v2470_v59 = vsel %vm2275_vm3, %v2466_v56, -inf  ;;  %v5456_v61 = vpop.f32.mrf.mxu1  ;;  %v2473_v1 = vsel %vm2275_vm3, %v2467_v60, -inf }
 0x254   : > { %2471 = vmax.xlane.f32.xlu0 %v2470_v59 }
 0x255   : > { %v2319_v62 = vpop.f32.mrf.mxu0  ;;  %v2365_v63 = vpop.f32.mrf.mxu1 }
 0x257   : > { %v5451_v0 = vpop.f32.mrf.mxu0  ;;  %v5457_v3 = vpop.f32.mrf.mxu1 }
 0x258   : > { %2474 = vmax.xlane.f32.xlu0 %v2473_v1  ;;  %v1562_v0 = vld [vmem:[%s7019_s14 + $0x4] sm:$0xf]  ;;  %v1563_v3 = vld [vmem:[%s7019_s14 + $0x8] sm:$0xf] }
 0x259   : > { %v2408_v4 = vpop.f32.mrf.mxu0  ;;  %v2454_v7 = vpop.f32.mrf.mxu1  ;;  %v2761_v1 = vsel %vm2525_vm4, %v1562_v0, 0 }
 0x25a   : > { %v2468_v5 = vsel %vm6521_vm6, -1e+09, %v2408_v4  ;;  %v2469_v10 = vsel %vm6521_vm6, -1e+09, %v2454_v7  ;;  %v2807_v7 = vsel %vm2525_vm4, %v1563_v3, 0 }
 0x25b   : > { %v5462_v8 = vpop.f32.mrf.mxu0  ;;  %v2476_v9 = vsel %vm2275_vm3, %v2468_v5, -inf  ;;  %v5468_v11 = vpop.f32.mrf.mxu1  ;;  %v2479_v15 = vsel %vm2275_vm3, %v2469_v10, -inf }
 0x25c   : > { %2477 = vmax.xlane.f32.xlu1 %v2476_v9  ;;  %v1564_v9 = vld [vmem:[%s7019_s14 + $0xc] sm:$0xf] }
 0x25d   : > { %v2411_v12 = vpop.f32.mrf.mxu0  ;;  %v2457_v13 = vpop.f32.mrf.mxu1 }
 0x25e   : > { %v2853_v13 = vsel %vm2525_vm4, %v1564_v9, 0 }
 0x25f   : > { %v5463_v14 = vpop.f32.mrf.mxu0  ;;  %v5469_v16 = vpop.f32.mrf.mxu1 }
 0x260   : > { %2480 = vmax.xlane.f32.xlu1 %v2479_v15 }
 0x2dd   : > { %v2472_v17 = vpop.xlane.xlu0 %2471 }
 0x2de   : > { %v2482_v18 = vsub.f32 %v2466_v56, %v2472_v17 }
 0x2e0   : > { %v2486_v19 = vmul.f32 1.442695, %v2482_v18 }
 0x2e1   : > { %v2475_v20 = vpop.xlane.xlu0 %2474 }
 0x2e2   : > { %5866 = vpow2.f32 %v2486_v19  ;;  %v2483_v21 = vsub.f32 %v2467_v60, %v2475_v20  ;;  %v2715_v60 = vsel %vm2525_vm4, %v1561_v57, 0 }
 0x2e4   : > { %v2488_v22 = vmul.f32 1.442695, %v2483_v21 }
 0x2e5   : > { %v2478_v23 = vpop.xlane.xlu1 %2477 }
 0x2e6   : > { %5868 = vpow2.f32 %v2488_v22  ;;  %v2484_v24 = vsub.f32 %v2468_v5, %v2478_v23 }
 0x2e8   : > { %v2490_v25 = vmul.f32 1.442695, %v2484_v24 }
 0x2e9   : > { %v2481_v26 = vpop.xlane.xlu1 %2480 }
 0x2ea   : > { %5870 = vpow2.f32 %v2490_v25  ;;  %v2485_v27 = vsub.f32 %v2469_v10, %v2481_v26 }
 0x2ec   : > { %v2492_v28 = vmul.f32 1.442695, %v2485_v27 }
 0x2ee   : > { %5872 = vpow2.f32 %v2492_v28 }
 0x2ef   : > { %v5867_v29 = vpop.eup %5866 }
 0x2f0   : > { %v2494_v30 = vsel %vm2275_vm3, %v5867_v29, 0.0 }
 0x2f1   : > { %2495 = vadd.xlane.f32.xlu0 %v2494_v30 }
 0x2f3   : > { %v5869_v31 = vpop.eup %5868 }
 0x2f4   : > { %v2497_v32 = vsel %vm2275_vm3, %v5869_v31, 0.0 }
 0x2f5   : > { %2498 = vadd.xlane.f32.xlu1 %v2497_v32 }
 0x2f7   : > { %v5871_v33 = vpop.eup %5870 }
 0x2f8   : > { %v2500_v34 = vsel %vm2275_vm3, %v5871_v33, 0.0 }
 0x2f9   : > { %2501 = vadd.xlane.f32.xlu0 %v2500_v34 }
 0x2fb   : > { %v5873_v35 = vpop.eup %5872 }
 0x2fc   : > { %v2503_v36 = vsel %vm2275_vm3, %v5873_v35, 0.0 }
 0x2fd   : > { %2504 = vadd.xlane.f32.xlu1 %v2503_v36 }
 0x37a   : > { %v2496_v37 = vpop.xlane.xlu0 %2495 }
 0x37b   : > { %5874 = vrcp.f32 %v2496_v37 }
 0x37e   : > { %v2499_v38 = vpop.xlane.xlu1 %2498 }
 0x37f   : > { %5876 = vrcp.f32 %v2499_v38 }
 0x382   : > { %v2502_v41 = vpop.xlane.xlu0 %2501 }
 0x383   : > { %5878 = vrcp.f32 %v2502_v41 }
 0x386   : > { %v2505_v44 = vpop.xlane.xlu1 %2504 }
 0x387   : > { %5880 = vrcp.f32 %v2505_v44 }
 0x388   : > { %v5875_v46 = vpop.eup %5874 }
 0x389   : > { %v2510_v49 = vmul.f32 %v5875_v46, %v5867_v29 }
 0x38b   : > { %v2514_v50 = vpack.c.bf16 %v2510_v49, %v2510_v49 }
 0x38c   : > { %v5877_v52 = vpop.eup %5876 }
 0x38d   : > { %5473 = vmatmul.mubr.msk.bf16.vlgmr.msra.gmra.mxu0 %vm2275_vm3, %v2514_v50  ;;  %v2511_v55 = vmul.f32 %v5877_v52, %v5869_v31 }
 0x38e   : > { %5483 = vmatpush3.bf16.msra.mxu0 %v2619_v53  ;;  %5484 = vmatprep.mubr.msk.bf16.mxu0 %vm6033_vm1, %v6032_v2 }
 0x38f   : > { %v2515_v40 = vpack.c.bf16 %v2511_v55, %v2511_v55  ;;  %5494 = vmatprep.subr.bf16.mxu0 %v6032_v2 }
 0x390   : > { %v5879_v56 = vpop.eup %5878 }
 0x391   : > { %5479 = vmatmul.mubr.msk.bf16.vlgmr.msra.gmra.mxu1 %vm2275_vm3, %v2515_v40  ;;  %v2512_v58 = vmul.f32 %v5879_v56, %v5871_v33 }
 0x392   : > { %5489 = vmatpush3.bf16.msra.mxu1 %v2665_v45  ;;  %5490 = vmatprep.mubr.msk.bf16.mxu1 %vm6033_vm1, %v6032_v2 }
 0x393   : > { %v2516_v59 = vpack.c.bf16 %v2512_v58, %v2512_v58  ;;  %5500 = vmatprep.subr.bf16.mxu1 %v6032_v2 }
 0x394   : > { %v5881_v61 = vpop.eup %5880 }
 0x395   : > { %5485 = vmatmul.mubr.msk.bf16.vlgmr.msra.gmra.mxu0 %vm2275_vm3, %v2516_v59  ;;  %v2513_v62 = vmul.f32 %v5881_v61, %v5873_v35  ;;  %v5836_v61 = vld [vmem:[%s7022_s18 + $0x8] sm:$0xff]  }
 0x396   : > { %5495 = vmatpush3.bf16.msra.mxu0 %v2715_v60  ;;  %5496 = vmatprep.mubr.msk.bf16.mxu0 %vm6033_vm1, %v6032_v2 }
 0x397   : > { %v2517_v63 = vpack.c.bf16 %v2513_v62, %v2513_v62  ;;  %5506 = vmatprep.subr.bf16.mxu0 %v6032_v2  ;;  %v5837_v62 = vld [vmem:[%s7022_s18 + $0x18] sm:$0xff]  }
 0x399   : > { %5491 = vmatmul.mubr.msk.bf16.vlgmr.msra.gmra.mxu1 %vm2275_vm3, %v2517_v63  ;;  %v5838_v63 = vld [vmem:[%s7022_s18] sm:$0xff]  }
 0x39a   : > { %5502 = vmatprep.mubr.msk.bf16.mxu1 %vm6033_vm1, %v6032_v2  ;;  %5501 = vmatpush3.bf16.msra.mxu1 %v2761_v1 }
 0x39b   : > { %5512 = vmatprep.subr.bf16.mxu1 %v6032_v2 }
 0x44d   : > { %v2563_v4 = vpop.f32.mrf.mxu0 }
 0x44e   : > { %v2707_v5 = vpack.c.bf16 %v2563_v4, %v2563_v4 }
 0x44f   : > { %v5474_v8 = vpop.f32.mrf.mxu0 }
 0x450   : > { %5497 = vmatmul.mubr.msk.bf16.vlgmr.msra.gmra.mxu0 %vm2275_vm3, %v2707_v5  ;;  %v5128_v5 = vld [vmem:[%s1471_s26] ss:$0 sm:$0xff]  ;;  %s7026_s26 = sld [smem:[#allocation53_spill]] }
 0x451   : > { %v2566_v10 = vpop.f32.mrf.mxu0  ;;  %v2609_v11 = vpop.f32.mrf.mxu1  ;;  %5507 = vmatpush3.bf16.msra.mxu0 %v2807_v7  ;;  %5508 = vmatprep.mubr.msk.bf16.mxu0 %vm6033_vm1, %v6032_v2  ;;  %v5129_v8 = vld [vmem:[%s1474_s16] ss:$0 sm:$0xff]  ;;  %s7027_s16 = sld [smem:[#allocation67_spill]] }
 0x452   : > { %v2708_v12 = vpack.c.bf16 %v2609_v11, %v2609_v11  ;;  %5518 = vmatprep.subr.bf16.mxu0 %v6032_v2  ;;  %v5840_v11 = vld [vmem:[%s7022_s18 + $0x28] sm:$0xff]  }
 0x453   : > { %v5475_v14 = vpop.f32.mrf.mxu0  ;;  %v5480_v15 = vpop.f32.mrf.mxu1 }
 0x454   : > { %5503 = vmatmul.mubr.msk.bf16.vlgmr.msra.gmra.mxu1 %vm2275_vm3, %v2708_v12  ;;  %v5841_v12 = vld [vmem:[%s7022_s18 + $0x38] sm:$0xff]   ;;  %v5842_v14 = vld [vmem:[%s7022_s18 + $0x20] sm:$0xff]   ;;  %v5843_v15 = vld [vmem:[%s7022_s18 + $0x30] sm:$0xff]  }
 0x455   : > { %v2612_v16 = vpop.f32.mrf.mxu1  ;;  %v2655_v17 = vpop.f32.mrf.mxu0  ;;  %5513 = vmatpush3.bf16.msra.mxu1 %v2853_v13  ;;  %5514 = vmatprep.mubr.msk.bf16.mxu1 %vm6033_vm1, %v6032_v2 }
 0x456   : > { %v2709_v18 = vpack.c.bf16 %v2655_v17, %v2655_v17  ;;  %5526 = vmatprep.subr.bf16.mxu1 %v6032_v2  ;;  %v5844_v16 = vld [vmem:[%s7025_s20 + $0x8] sm:$0xff]   ;;  %v5845_v17 = vld [vmem:[%s7025_s20 + $0x18] sm:$0xff]  }
 0x457   : > { %v5481_v19 = vpop.f32.mrf.mxu1  ;;  %v5486_v20 = vpop.f32.mrf.mxu0 }
 0x458   : > { %5509 = vmatmul.mubr.msk.bf16.vlgmr.msra.gmra.mxu0 %vm2275_vm3, %v2709_v18  ;;  %v5846_v18 = vld [vmem:[%s7025_s20] sm:$0xff]   ;;  %v5847_v19 = vld [vmem:[%s7025_s20 + $0x10] sm:$0xff]  }
 0x459   : > { %v2658_v21 = vpop.f32.mrf.mxu0  ;;  %v2701_v22 = vpop.f32.mrf.mxu1  ;;  %5522 = vmatprep.mubr.msk.bf16.mxu0 %vm6033_vm1, %v6032_v2  ;;  %5519 = vmatpush3.bf16.msra.mxu0 %v5836_v61  ;;  %v1498_v20 = vld [vmem:[%s7026_s26] sm:$0xff] }
 0x45a   : > { %v2710_v23 = vpack.c.bf16 %v2701_v22, %v2701_v22  ;;  %5520 = vmatprep.subr.bf16.mxu0 %v6032_v2  ;;  %v3006_v21 = vpack.c.bf16 %v1498_v20, %v1498_v20  ;;  %v5848_v22 = vld [vmem:[%s7025_s20 + $0x28] sm:$0xff]   ;;  %v5130_v61 = vld [vmem:[%s7029_s9] ss:$0 sm:$0xff] }
 0x45b   : > { %v5487_v24 = vpop.f32.mrf.mxu0  ;;  %v5492_v25 = vpop.f32.mrf.mxu1 }
 0x45c   : > { %5515 = vmatmul.mubr.msk.bf16.vlgmr.msra.gmra.mxu1 %vm2275_vm3, %v2710_v23  ;;  %v5849_v23 = vld [vmem:[%s7025_s20 + $0x38] sm:$0xff]   ;;  %v5850_v24 = vld [vmem:[%s7025_s20 + $0x20] sm:$0xff]   ;;  %v5851_v25 = vld [vmem:[%s7025_s20 + $0x30] sm:$0xff]  }
 0x45d   : > { %v2704_v26 = vpop.f32.mrf.mxu1  ;;  %5530 = vmatprep.mubr.msk.bf16.mxu1 %vm6033_vm1, %v6032_v2  ;;  %5527 = vmatpush3.bf16.msra.mxu1 %v5837_v62  ;;  %v5131_v62 = vld [vmem:[%s7029_s9 + $0x1] ss:$0 sm:$0xff] }
 0x45e   : > { %5528 = vmatprep.subr.bf16.mxu1 %v6032_v2  ;;  %5521 = vmatpush3.bf16.msra.mxu0 %v5838_v63  ;;  %v5852_v26 = vld [vmem:[%s7027_s16 + $0x8] sm:$0xff]  }
 0x45f   : > { %v5493_v27 = vpop.f32.mrf.mxu1  ;;  %5534 = vmatprep.subr.bf16.mxu0 %v6032_v2 }
 0x460   : > { %v5853_v27 = vld [vmem:[%s7027_s16 + $0x18] sm:$0xff]  }
 0x510   : > { %v2751_v28 = vpop.f32.mrf.mxu0 }
 0x511   : > { %v2895_v37 = vsel %vm1603_vm2, %v2751_v28, 0.0  ;;  %v5854_v28 = vld [vmem:[%s7027_s16] sm:$0xff]  }
 0x512   : > { %v5498_v29 = vpop.f32.mrf.mxu0 }
 0x513   : > { %v5855_v29 = vld [vmem:[%s7027_s16 + $0x10] sm:$0xff]  }
 0x514   : > { %v2754_v30 = vpop.f32.mrf.mxu0  ;;  %v2797_v31 = vpop.f32.mrf.mxu1 }
 0x515   : > { %v2896_v34 = vsel %vm1603_vm2, %v2797_v31, 0.0  ;;  %v5856_v30 = vld [vmem:[%s7027_s16 + $0x28] sm:$0xff]   ;;  %v5857_v31 = vld [vmem:[%s7027_s16 + $0x38] sm:$0xff]  }
 0x516   : > { %v5499_v32 = vpop.f32.mrf.mxu0  ;;  %v5504_v33 = vpop.f32.mrf.mxu1  ;;  %v2897_v39 = vadd.f32 %v2896_v34, %v2895_v37 }
 0x517   : > { %v5858_v32 = vld [vmem:[%s7027_s16 + $0x20] sm:$0xff]   ;;  %v5859_v33 = vld [vmem:[%s7027_s16 + $0x30] sm:$0xff]  }
 0x518   : > { %v2800_v35 = vpop.f32.mrf.mxu1  ;;  %v2843_v36 = vpop.f32.mrf.mxu0 }
 0x519   : > { %v2898_v38 = vsel %vm1603_vm2, %v2843_v36, 0.0 }
 0x51a   : > { %v5505_v41 = vpop.f32.mrf.mxu1  ;;  %v5510_v42 = vpop.f32.mrf.mxu0  ;;  %v2899_v43 = vadd.f32 %v2898_v38, %v2897_v39 }
 0x51c   : > { %v2846_v44 = vpop.f32.mrf.mxu0  ;;  %v2889_v46 = vpop.f32.mrf.mxu1 }
 0x51d   : > { %v2900_v48 = vsel %vm1603_vm2, %v2889_v46, 0.0 }
 0x51e   : > { %v2901_v49 = vadd.f32 %v2900_v48, %v2899_v43  ;;  %v5511_v50 = vpop.f32.mrf.mxu0  ;;  %v5516_v52 = vpop.f32.mrf.mxu1 }
 0x520   : > { %v2908_v53 = vadd.f32 %v5127_v47, %v2901_v49  ;;  %v2892_v54 = vpop.f32.mrf.mxu1 }
 0x521   : > { %v5147_v54 = vld [vmem:[%s7028_s7 + $0x1] ss:$0 sm:$0xff] }
 0x522   : > { %v5517_v55 = vpop.f32.mrf.mxu1  ;;  %v2909_v40 = vadd.f32 %v2908_v53, %v6385_v6  ;;  %v5839_v6 = vld [vmem:[%s7022_s18 + $0x10] sm:$0xff]   ;;  %v5146_v53 = vld [vmem:[%s7028_s7] ss:$0 sm:$0xff] }
 0x523   : > { %5529 = vmatpush3.bf16.msra.mxu1 %v5839_v6 }
 0x524   : > { %v2912_v56 = vsel %vm1603_vm2, %v2909_v40, 0.0  ;;  %5542 = vmatprep.subr.bf16.mxu1 %v6032_v2 }
 0x525   : > { %2913 = vadd.xlane.f32.xlu0 %v2912_v56 }
 0x5ae   : > { %v2914_v57 = vpop.xlane.xlu0 %2913 }
 0x5af   : > { %v2916_v45 = vmul.f32 0.03125, %v2914_v57 }
 0x5b1   : > { %v2917_v58 = vsub.f32 %v2909_v40, %v2916_v45 }
 0x5b3   : > { %v2918_v59 = vmul.f32 %v2917_v58, %v2917_v58 }
 0x5b5   : > { %v2919_v60 = vsel %vm1603_vm2, %v2918_v59, 0.0 }
 0x5b6   : > { %2920 = vadd.xlane.f32.xlu1 %v2919_v60 }
 0x63f   : > { %v2921_v0 = vpop.xlane.xlu1 %2920 }
 0x640   : > { %v2922_v1 = vmul.f32 0.03125, %v2921_v0 }
 0x642   : > { %v2923_v3 = vadd.f32 1e-05, %v2922_v1 }
 0x644   : > { %5882 = vrsqrt.f32 %v2923_v3 }
 0x651   : > { %v5883_v4 = vpop.eup %5882 }
 0x652   : > { %v2925_v7 = vmul.f32 %v5883_v4, %v2917_v58 }
 0x654   : > { %v2932_v9 = vmul.f32 %v5128_v5, %v2925_v7  ;;  %v5148_v5 = vld [vmem:[%s7028_s7 + $0x2] ss:$0 sm:$0xff]  ;;  %v5149_v7 = vld [vmem:[%s7028_s7 + $0x3] ss:$0 sm:$0xff] }
 0x656   : > { %v6609_v10 = vadd.f32 %v5129_v8, %v2932_v9 }
 0x658   : > { %v3005_v13 = vpack.c.bf16 %v6609_v10, %v6609_v10 }
 0x65a   : > { %5523 = vmatmul.mubr.msk.bf16.vlgmr.msra.gmra.mxu0 %vm1603_vm2, %v3005_v13  ;;  %5531 = vmatmul.mubr.msk.bf16.vlgmr.msra.gmra.mxu1 %vm1603_vm2, %v3005_v13 }
 0x65b   : > { %5535 = vmatpush3.bf16.msra.mxu0 %v5840_v11  ;;  %5543 = vmatpush3.bf16.msra.mxu1 %v5841_v12 }
 0x65c   : > { %5536 = vmatprep.subr.bf16.mxu0 %v6032_v2  ;;  %5544 = vmatprep.subr.bf16.mxu1 %v6032_v2 }
 0x65d   : > { %5538 = vmatprep.mubr.msk.bf16.mxu0 %vm6033_vm1, %v6032_v2  ;;  %5546 = vmatprep.mubr.msk.bf16.mxu1 %vm6033_vm1, %v6032_v2 }
 0x65f   : > { %5537 = vmatpush3.bf16.msra.mxu0 %v5842_v14  ;;  %5545 = vmatpush3.bf16.msra.mxu1 %v5843_v15 }
 0x660   : > { %5550 = vmatprep.subr.bf16.mxu0 %v6032_v2  ;;  %5558 = vmatprep.subr.bf16.mxu1 %v6032_v2 }
 0x662   : > { %5539 = vmatmul.mubr.msk.bf16.vlgmr.msra.gmra.mxu0 %vm1603_vm2, %v3005_v13  ;;  %5547 = vmatmul.mubr.msk.bf16.vlgmr.msra.gmra.mxu1 %vm1603_vm2, %v3005_v13 }
 0x663   : > { %5551 = vmatpush3.bf16.msra.mxu0 %v5844_v16  ;;  %5559 = vmatpush3.bf16.msra.mxu1 %v5845_v17 }
 0x664   : > { %5552 = vmatprep.subr.bf16.mxu0 %v6032_v2  ;;  %5560 = vmatprep.subr.bf16.mxu1 %v6032_v2 }
 0x665   : > { %5554 = vmatprep.mubr.msk.bf16.mxu0 %vm6033_vm1, %v6032_v2  ;;  %5562 = vmatprep.mubr.msk.bf16.mxu1 %vm6033_vm1, %v6032_v2 }
 0x667   : > { %5553 = vmatpush3.bf16.msra.mxu0 %v5846_v18  ;;  %5561 = vmatpush3.bf16.msra.mxu1 %v5847_v19 }
 0x668   : > { %5566 = vmatprep.subr.bf16.mxu0 %v6032_v2  ;;  %5574 = vmatprep.subr.bf16.mxu1 %v6032_v2 }
 0x66a   : > { %5555 = vmatmul.mubr.msk.bf16.vlgmr.msra.gmra.mxu0 %vm1603_vm2, %v3006_v21  ;;  %5563 = vmatmul.mubr.msk.bf16.vlgmr.msra.gmra.mxu1 %vm1603_vm2, %v3006_v21 }
 0x66b   : > { %5567 = vmatpush3.bf16.msra.mxu0 %v5848_v22  ;;  %5575 = vmatpush3.bf16.msra.mxu1 %v5849_v23  ;;  %v5133_v22 = vld [vmem:[%s7029_s9 + $0x3] ss:$0 sm:$0xff] }
 0x66c   : > { %5568 = vmatprep.subr.bf16.mxu0 %v6032_v2  ;;  %5576 = vmatprep.subr.bf16.mxu1 %v6032_v2 }
 0x66d   : > { %5570 = vmatprep.mubr.msk.bf16.mxu0 %vm6033_vm1, %v6032_v2  ;;  %5578 = vmatprep.mubr.msk.bf16.mxu1 %vm6033_vm1, %v6032_v2 }
 0x66f   : > { %5569 = vmatpush3.bf16.msra.mxu0 %v5850_v24  ;;  %5577 = vmatpush3.bf16.msra.mxu1 %v5851_v25 }
 0x670   : > { %5582 = vmatprep.subr.bf16.mxu0 %v6032_v2  ;;  %5590 = vmatprep.subr.bf16.mxu1 %v6032_v2 }
 0x672   : > { %5571 = vmatmul.mubr.msk.bf16.vlgmr.msra.gmra.mxu0 %vm1603_vm2, %v3006_v21  ;;  %5579 = vmatmul.mubr.msk.bf16.vlgmr.msra.gmra.mxu1 %vm1603_vm2, %v3006_v21 }
 0x673   : > { %5586 = vmatprep.mubr.msk.bf16.mxu0 %vm6033_vm1, %v6032_v2  ;;  %5594 = vmatprep.mubr.msk.bf16.mxu1 %vm6033_vm1, %v6032_v2 }
 0x674   : > { %5583 = vmatpush3.bf16.msra.mxu0 %v5852_v26  ;;  %5591 = vmatpush3.bf16.msra.mxu1 %v5853_v27 }
 0x675   : > { %5584 = vmatprep.subr.bf16.mxu0 %v6032_v2  ;;  %5592 = vmatprep.subr.bf16.mxu1 %v6032_v2 }
 0x678   : > { %5585 = vmatpush3.bf16.msra.mxu0 %v5854_v28  ;;  %5593 = vmatpush3.bf16.msra.mxu1 %v5855_v29 }
 0x679   : > { %5598 = vmatprep.subr.bf16.mxu0 %v6032_v2  ;;  %5606 = vmatprep.subr.bf16.mxu1 %v6032_v2 }
 0x67b   : > { %5587 = vmatmul.mubr.msk.bf16.vlgmr.msra.gmra.mxu0 %vm1603_vm2, %v3006_v21  ;;  %5595 = vmatmul.mubr.msk.bf16.vlgmr.msra.gmra.mxu1 %vm1603_vm2, %v3006_v21 }
 0x67c   : > { %5599 = vmatpush3.bf16.msra.mxu0 %v5856_v30  ;;  %5602 = vmatprep.mubr.msk.bf16.mxu0 %vm6033_vm1, %v6032_v2 }
 0x67d   : > { %5600 = vmatprep.subr.bf16.mxu0 %v6032_v2  ;;  %5607 = vmatpush3.bf16.msra.mxu1 %v5857_v31 }
 0x67e   : > { %5610 = vmatprep.mubr.msk.bf16.mxu1 %vm6033_vm1, %v6032_v2  ;;  %5608 = vmatprep.subr.bf16.mxu1 %v6032_v2 }
 0x680   : > { %5601 = vmatpush3.bf16.msra.mxu0 %v5858_v32 }
 0x681   : > { %5614 = vmatprep.subr.bf16.mxu0 %v6032_v2  ;;  %5609 = vmatpush3.bf16.msra.mxu1 %v5859_v33  ;;  %v5162_v33 = vld [vmem:[%s6340_s19] ss:$0 sm:$0xff] }
 0x682   : > { %5620 = vmatprep.subr.bf16.mxu1 %v6032_v2 }
 0x683   : > { %5603 = vmatmul.mubr.msk.bf16.vlgmr.msra.gmra.mxu0 %vm1603_vm2, %v3006_v21 }
 0x684   : > { %5616 = vmatprep.mubr.msk.bf16.mxu0 %vm6033_vm1, %v6032_v2  ;;  %5611 = vmatmul.mubr.msk.bf16.vlgmr.msra.gmra.mxu1 %vm1603_vm2, %v3006_v21  ;;  %v5132_v21 = vld [vmem:[%s7029_s9 + $0x2] ss:$0 sm:$0xff] }
 0x685   : > { %5622 = vmatprep.mubr.msk.bf16.mxu1 %vm6033_vm1, %v6032_v2 }
 0x71a   : > { %v3080_v34 = vpop.f32.mrf.mxu0  ;;  %v3132_v35 = vpop.f32.mrf.mxu1 }
 0x71b   : > { %v3081_v8 = vadd.f32 %v5130_v61, %v3080_v34  ;;  %v3133_v9 = vadd.f32 %v5131_v62, %v3132_v35  ;;  %v5163_v35 = vld [vmem:[%s6340_s19 + $0x1] ss:$0 sm:$0xff] }
 0x71c   : > { %v5524_v36 = vpop.f32.mrf.mxu0  ;;  %v5532_v37 = vpop.f32.mrf.mxu1 }
 0x71d   : > { %v3709_v17 = vpack.c.bf16 %v3081_v8, %v3081_v8  ;;  %v3710_v18 = vpack.c.bf16 %v3133_v9, %v3133_v9 }
 0x71e   : > { %v3083_v38 = vpop.f32.mrf.mxu0  ;;  %v3135_v39 = vpop.f32.mrf.mxu1 }
 0x720   : > { %v5525_v41 = vpop.f32.mrf.mxu0  ;;  %v5533_v42 = vpop.f32.mrf.mxu1 }
 0x722   : > { %v3184_v43 = vpop.f32.mrf.mxu0  ;;  %v3236_v44 = vpop.f32.mrf.mxu1 }
 0x723   : > { %v3185_v29 = vadd.f32 %v5132_v21, %v3184_v43  ;;  %v3237_v30 = vadd.f32 %v5133_v22, %v3236_v44 }
 0x724   : > { %v5540_v46 = vpop.f32.mrf.mxu0  ;;  %v5548_v47 = vpop.f32.mrf.mxu1 }
 0x725   : > { %v3711_v31 = vpack.c.bf16 %v3185_v29, %v3185_v29  ;;  %v3712_v32 = vpack.c.bf16 %v3237_v30, %v3237_v30 }
 0x726   : > { %v3187_v48 = vpop.f32.mrf.mxu0  ;;  %v3239_v49 = vpop.f32.mrf.mxu1 }
 0x728   : > { %v5541_v50 = vpop.f32.mrf.mxu0  ;;  %v5549_v52 = vpop.f32.mrf.mxu1 }
 0x72a   : > { %v3315_v55 = vpop.f32.mrf.mxu0  ;;  %v3367_v40 = vpop.f32.mrf.mxu1 }
 0x72b   : > { %v3316_v56 = vadd.f32 %v5146_v53, %v3315_v55  ;;  %v3368_v57 = vadd.f32 %v5147_v54, %v3367_v40 }
 0x72c   : > { %v5556_v45 = vpop.f32.mrf.mxu0  ;;  %v5564_v58 = vpop.f32.mrf.mxu1 }
 0x72d   : > { %v3713_v59 = vpack.c.bf16 %v3316_v56, %v3316_v56  ;;  %v3714_v60 = vpack.c.bf16 %v3368_v57, %v3368_v57  ;;  %v1500_v58 = vld [vmem:[%s7030_s5] sm:$0xf] }
 0x72e   : > { %v3318_v63 = vpop.f32.mrf.mxu0  ;;  %v3370_v6 = vpop.f32.mrf.mxu1  ;;  %vm3901_vm7 = vcmp.eq.bf16.partialorder %v1500_v58, 0 }
 0x72f   : > { %v3721_v0 = vsel %vm2275_vm3, %v3713_v59, 0  ;;  %v3767_v1 = vsel %vm2275_vm3, %v3714_v60, 0  ;;  %v3902_v59 = vsel %vm3901_vm7, 65537, %v6034_v51 }
 0x730   : > { %v5557_v3 = vpop.f32.mrf.mxu0  ;;  %v5565_v4 = vpop.f32.mrf.mxu1  ;;  %5615 = vmatpush3.bf16.xpose.msra.mxu0 %v3721_v0  ;;  %5621 = vmatpush3.bf16.xpose.msra.mxu1 %v3767_v1  ;;  %v3903_v60 = vunpack.c.l.b16 %v3902_v59 }
 0x731   : > { %5626 = vmatprep.subr.bf16.mxu0 %v6032_v2  ;;  %5632 = vmatprep.subr.bf16.mxu1 %v6032_v2 }
 0x732   : > { %v3419_v11 = vpop.f32.mrf.mxu0  ;;  %v3471_v12 = vpop.f32.mrf.mxu1  ;;  %vm6730_vm8 = vcmp.ne.s32.totalorder %v3903_v60, 0 }
 0x733   : > { %v3420_v13 = vadd.f32 %v5148_v5, %v3419_v11  ;;  %v3472_v14 = vadd.f32 %v5149_v7, %v3471_v12 }
 0x734   : > { %v5572_v15 = vpop.f32.mrf.mxu0  ;;  %v5580_v16 = vpop.f32.mrf.mxu1 }
 0x735   : > { %v3715_v19 = vpack.c.bf16 %v3420_v13, %v3420_v13  ;;  %v3716_v20 = vpack.c.bf16 %v3472_v14, %v3472_v14 }
 0x736   : > { %v3422_v23 = vpop.f32.mrf.mxu0  ;;  %v3474_v24 = vpop.f32.mrf.mxu1 }
 0x737   : > { %v3813_v25 = vsel %vm2275_vm3, %v3715_v19, 0  ;;  %v3859_v26 = vsel %vm2275_vm3, %v3716_v20, 0  ;;  %5617 = vmatmul.mubr.msk.bf16.vlgmr.msra.gmra.mxu0 %vm2275_vm3, %v3709_v17  ;;  %5623 = vmatmul.mubr.msk.bf16.vlgmr.msra.gmra.mxu1 %vm2275_vm3, %v3710_v18 }
 0x738   : > { %v5573_v27 = vpop.f32.mrf.mxu0  ;;  %v5581_v28 = vpop.f32.mrf.mxu1  ;;  %5627 = vmatpush3.bf16.xpose.msra.mxu0 %v3813_v25  ;;  %5633 = vmatpush3.bf16.xpose.msra.mxu1 %v3859_v26 }
 0x739   : > { %5628 = vmatprep.mubr.msk.bf16.mxu0 %vm6033_vm1, %v6032_v2  ;;  %5634 = vmatprep.mubr.msk.bf16.mxu1 %vm6033_vm1, %v6032_v2 }
 0x73a   : > { %5638 = vmatprep.subr.bf16.mxu0 %v6032_v2  ;;  %5644 = vmatprep.subr.bf16.mxu1 %v6032_v2 }
 0x73b   : > { %v3547_v34 = vpop.f32.mrf.mxu0  ;;  %v3599_v38 = vpop.f32.mrf.mxu1 }
 0x73c   : > { %v3548_v36 = vadd.f32 %v5162_v33, %v3547_v34  ;;  %v3600_v41 = vadd.f32 %v5163_v35, %v3599_v38 }
 0x73d   : > { %v5588_v37 = vpop.f32.mrf.mxu0  ;;  %v5596_v43 = vpop.f32.mrf.mxu1 }
 0x73e   : > { %v3959_v39 = vpack.c.bf16 %v3548_v36, %v3548_v36  ;;  %v3960_v46 = vpack.c.bf16 %v3600_v41, %v3600_v41 }
 0x73f   : > { %5629 = vmatmul.mubr.msk.bf16.vlgmr.msra.gmra.mxu0 %vm2275_vm3, %v3711_v31  ;;  %5635 = vmatmul.mubr.msk.bf16.vlgmr.msra.gmra.mxu1 %vm2275_vm3, %v3712_v32  ;;  %v3550_v42 = vpop.f32.mrf.mxu0  ;;  %v3602_v48 = vpop.f32.mrf.mxu1 }
 0x740   : > { %5640 = vmatprep.mubr.msk.bf16.mxu0 %vm6033_vm1, %v6032_v2  ;;  %5646 = vmatprep.mubr.msk.bf16.mxu1 %vm6033_vm1, %v6032_v2  ;;  %v3967_v44 = vsel %vm2525_vm4, %v3959_v39, 0  ;;  %v4013_v49 = vsel %vm2525_vm4, %v3960_v46, 0 }
 0x741   : > { %v5589_v47 = vpop.f32.mrf.mxu0  ;;  %5639 = vmatpush3.bf16.msra.mxu0 %v3967_v44  ;;  %v5597_v50 = vpop.f32.mrf.mxu1  ;;  %5645 = vmatpush3.bf16.msra.mxu1 %v4013_v49  ;;  %v5164_v49 = vld [vmem:[%s6340_s19 + $0x2] ss:$0 sm:$0xff] }
 0x742   : > { %5650 = vmatprep.subr.bf16.mxu0 %v6032_v2  ;;  %5656 = vmatprep.subr.bf16.mxu1 %v6032_v2  ;;  %v5165_v47 = vld [vmem:[%s6340_s19 + $0x3] ss:$0 sm:$0xff] }
 0x743   : > { %v6723_v52 = vpop.f32.mrf.mxu0 }
 0x744   : > { %v6726_v54 = vpop.f32.mrf.mxu1 }
 0x745   : > { %v5604_v53 = vpop.f32.mrf.mxu0 }
 0x746   : > { %v5612_v40 = vpop.f32.mrf.mxu1  ;;  %v3704_v53 = vadd.f32 %v5165_v47, %v6726_v54  ;;  %v3001_v54 = vld [vmem:[%s6343_s29 + $0x4] sm:$0xf] }
 0x747   : > { %v3654_v55 = vpop.f32.mrf.mxu0 }
 0x748   : > { %v3706_v57 = vpop.f32.mrf.mxu1  ;;  %v3652_v55 = vadd.f32 %v5164_v49, %v6723_v52 }
 0x749   : > { %v5605_v56 = vpop.f32.mrf.mxu0  ;;  %v3962_v57 = vpack.c.bf16 %v3704_v53, %v3704_v53 }
 0x74a   : > { %v5613_v45 = vpop.f32.mrf.mxu1  ;;  %v3961_v58 = vpack.c.bf16 %v3652_v55, %v3652_v55  ;;  %v5190_v55 = vld [vmem:[%s1452_s30] ss:$0 sm:$0xff] }
 0x7f7   : > { %v3757_v62 = vpop.f32.mrf.mxu0  ;;  %v3803_v63 = vpop.f32.mrf.mxu1 }
 0x7f8   : > { %v3907_v6 = vsel %vm6730_vm8, -1e+09, %v3757_v62  ;;  %v3908_v0 = vsel %vm6730_vm8, -1e+09, %v3803_v63  ;;  %v4105_v62 = vsel %vm2525_vm4, %v3962_v57, 0  ;;  %v4059_v63 = vsel %vm2525_vm4, %v3961_v58, 0 }
 0x7f9   : > { %v5618_v1 = vpop.f32.mrf.mxu0  ;;  %v5624_v3 = vpop.f32.mrf.mxu1  ;;  %v3914_v4 = vsel %vm2275_vm3, %v3908_v0, -inf  ;;  %v3911_v5 = vsel %vm2275_vm3, %v3907_v6, -inf }
 0x7fa   : > { %3915 = vmax.xlane.f32.xlu1 %v3914_v4  ;;  %3912 = vmax.xlane.f32.xlu0 %v3911_v5  ;;  %v3000_v1 = vld [vmem:[%s6343_s29] sm:$0xf]  ;;  %v4201_v5 = vsel %vm2525_vm4, %v3001_v54, 0 }
 0x7fb   : > { %v3760_v51 = vpop.f32.mrf.mxu0  ;;  %v3806_v7 = vpop.f32.mrf.mxu1 }
 0x7fc   : > { %v4155_v7 = vsel %vm2525_vm4, %v3000_v1, 0  ;;  %v5860_v1 = vld [vmem:[%s6348_s3 + $0x8] sm:$0xff]  }
 0x7fd   : > { %v5619_v8 = vpop.f32.mrf.mxu0  ;;  %v5625_v9 = vpop.f32.mrf.mxu1 }
 0x7fe   : > { %v3003_v8 = vld [vmem:[%s6343_s29 + $0xc] sm:$0xf]  ;;  %v3002_v9 = vld [vmem:[%s6343_s29 + $0x8] sm:$0xf] }
 0x7ff   : > { %v3849_v11 = vpop.f32.mrf.mxu0  ;;  %v3895_v12 = vpop.f32.mrf.mxu1 }
 0x800   : > { %v3909_v13 = vsel %vm6730_vm8, -1e+09, %v3849_v11  ;;  %v3910_v14 = vsel %vm6730_vm8, -1e+09, %v3895_v12 }
 0x801   : > { %v5630_v15 = vpop.f32.mrf.mxu0  ;;  %v5636_v16 = vpop.f32.mrf.mxu1  ;;  %v3920_v17 = vsel %vm2275_vm3, %v3910_v14, -inf  ;;  %v3917_v18 = vsel %vm2275_vm3, %v3909_v13, -inf }
 0x802   : > { %3921 = vmax.xlane.f32.xlu1 %v3920_v17  ;;  %3918 = vmax.xlane.f32.xlu0 %v3917_v18  ;;  %v4247_v17 = vsel %vm2525_vm4, %v3002_v9, 0  ;;  %v5191_v9 = vld [vmem:[%s1477_s27] ss:$0 sm:$0xff] }
 0x803   : > { %v3852_v19 = vpop.f32.mrf.mxu0  ;;  %v3898_v20 = vpop.f32.mrf.mxu1 }
 0x805   : > { %v5631_v21 = vpop.f32.mrf.mxu0  ;;  %v5637_v22 = vpop.f32.mrf.mxu1 }
 0x883   : > { %v3916_v23 = vpop.xlane.xlu1 %3915  ;;  %v3913_v24 = vpop.xlane.xlu0 %3912 }
 0x884   : > { %v3924_v25 = vsub.f32 %v3908_v0, %v3916_v23  ;;  %v3923_v26 = vsub.f32 %v3907_v6, %v3913_v24 }
 0x886   : > { %v3929_v27 = vmul.f32 1.442695, %v3924_v25  ;;  %v3927_v28 = vmul.f32 1.442695, %v3923_v26 }
 0x888   : > { %5884 = vpow2.f32 %v3929_v27 }
 0x889   : > { %5886 = vpow2.f32 %v3927_v28 }
 0x88b   : > { %v3922_v29 = vpop.xlane.xlu1 %3921  ;;  %v3919_v30 = vpop.xlane.xlu0 %3918 }
 0x88c   : > { %v3926_v31 = vsub.f32 %v3910_v14, %v3922_v29  ;;  %v3925_v32 = vsub.f32 %v3909_v13, %v3919_v30  ;;  %v4293_v14 = vsel %vm2525_vm4, %v3003_v8, 0 }
 0x88e   : > { %v3933_v33 = vmul.f32 1.442695, %v3926_v31  ;;  %v3931_v34 = vmul.f32 1.442695, %v3925_v32 }
 0x890   : > { %5888 = vpow2.f32 %v3933_v33 }
 0x891   : > { %5890 = vpow2.f32 %v3931_v34 }
 0x895   : > { %v5885_v35 = vpop.eup %5884 }
 0x896   : > { %v5887_v36 = vpop.eup %5886  ;;  %v3938_v37 = vsel %vm2275_vm3, %v5885_v35, 0.0 }
 0x897   : > { %3939 = vadd.xlane.f32.xlu1 %v3938_v37  ;;  %v3935_v38 = vsel %vm2275_vm3, %v5887_v36, 0.0 }
 0x898   : > { %3936 = vadd.xlane.f32.xlu0 %v3935_v38 }
 0x89d   : > { %v5889_v39 = vpop.eup %5888 }
 0x89e   : > { %v5891_v41 = vpop.eup %5890  ;;  %v3944_v42 = vsel %vm2275_vm3, %v5889_v39, 0.0 }
 0x89f   : > { %3945 = vadd.xlane.f32.xlu1 %v3944_v42  ;;  %v3941_v43 = vsel %vm2275_vm3, %v5891_v41, 0.0 }
 0x8a0   : > { %3942 = vadd.xlane.f32.xlu0 %v3941_v43 }
 0x920   : > { %v3940_v44 = vpop.xlane.xlu1 %3939 }
 0x921   : > { %5892 = vrcp.f32 %v3940_v44  ;;  %v3937_v46 = vpop.xlane.xlu0 %3936 }
 0x922   : > { %5894 = vrcp.f32 %v3937_v46 }
 0x928   : > { %v3946_v48 = vpop.xlane.xlu1 %3945 }
 0x929   : > { %5896 = vrcp.f32 %v3946_v48  ;;  %v3943_v50 = vpop.xlane.xlu0 %3942 }
 0x92a   : > { %5898 = vrcp.f32 %v3943_v50 }
 0x92e   : > { %v5893_v40 = vpop.eup %5892 }
 0x92f   : > { %v5895_v56 = vpop.eup %5894  ;;  %v3952_v45 = vmul.f32 %v5893_v40, %v5885_v35 }
 0x930   : > { %v3951_v59 = vmul.f32 %v5895_v56, %v5887_v36 }
 0x931   : > { %v3956_v60 = vpack.c.bf16 %v3952_v45, %v3952_v45 }
 0x932   : > { %v3955_v61 = vpack.c.bf16 %v3951_v59, %v3951_v59 }
 0x933   : > { %5647 = vmatmul.mubr.msk.bf16.vlgmr.msra.gmra.mxu1 %vm2275_vm3, %v3956_v60 }
 0x934   : > { %5641 = vmatmul.mubr.msk.bf16.vlgmr.msra.gmra.mxu0 %vm2275_vm3, %v3955_v61  ;;  %5657 = vmatpush3.bf16.msra.mxu1 %v4105_v62 }
 0x935   : > { %5651 = vmatpush3.bf16.msra.mxu0 %v4059_v63  ;;  %5652 = vmatprep.mubr.msk.bf16.mxu0 %vm6033_vm1, %v6032_v2 }
 0x936   : > { %v5897_v52 = vpop.eup %5896  ;;  %5658 = vmatprep.mubr.msk.bf16.mxu1 %vm6033_vm1, %v6032_v2  ;;  %5662 = vmatprep.subr.bf16.mxu0 %v6032_v2 }
 0x937   : > { %v5899_v6 = vpop.eup %5898  ;;  %v3954_v0 = vmul.f32 %v5897_v52, %v5889_v39  ;;  %5668 = vmatprep.subr.bf16.mxu1 %v6032_v2 }
 0x938   : > { %v3953_v3 = vmul.f32 %v5899_v6, %v5891_v41 }
 0x939   : > { %v3958_v4 = vpack.c.bf16 %v3954_v0, %v3954_v0 }
 0x93a   : > { %v3957_v51 = vpack.c.bf16 %v3953_v3, %v3953_v3  ;;  %v5861_v3 = vld [vmem:[%s6348_s3] sm:$0xff]  }
 0x93b   : > { %5659 = vmatmul.mubr.msk.bf16.vlgmr.msra.gmra.mxu1 %vm2275_vm3, %v3958_v4  ;;  %v5863_v4 = vld [vmem:[%s6354_s22 + $0x10] sm:$0xff]  }
 0x93c   : > { %5653 = vmatmul.mubr.msk.bf16.vlgmr.msra.gmra.mxu0 %vm2275_vm3, %v3957_v51  ;;  %5669 = vmatpush3.bf16.msra.mxu1 %v4201_v5 }
 0x93d   : > { %5663 = vmatpush3.bf16.msra.mxu0 %v4155_v7  ;;  %5664 = vmatprep.mubr.msk.bf16.mxu0 %vm6033_vm1, %v6032_v2 }
 0x93e   : > { %5670 = vmatprep.mubr.msk.bf16.mxu1 %vm6033_vm1, %v6032_v2  ;;  %5674 = vmatprep.subr.bf16.mxu0 %v6032_v2 }
 0x93f   : > { %5680 = vmatprep.subr.bf16.mxu1 %v6032_v2 }
 0x9f3   : > { %v4049_v11 = vpop.f32.mrf.mxu1 }
 0x9f4   : > { %v4003_v12 = vpop.f32.mrf.mxu0  ;;  %v4148_v13 = vpack.c.bf16 %v4049_v11, %v4049_v11 }
 0x9f5   : > { %v4147_v15 = vpack.c.bf16 %v4003_v12, %v4003_v12  ;;  %v5648_v16 = vpop.f32.mrf.mxu1  ;;  %v5192_v12 = vld [vmem:[%s1480_s1] ss:$0 sm:$0xff] }
 0x9f6   : > { %v5642_v18 = vpop.f32.mrf.mxu0  ;;  %5671 = vmatmul.mubr.msk.bf16.vlgmr.msra.gmra.mxu1 %vm2275_vm3, %v4148_v13  ;;  %v5864_v16 = vld [vmem:[%s6354_s22 + $0x8] sm:$0xff]  }
 0x9f7   : > { %5665 = vmatmul.mubr.msk.bf16.vlgmr.msra.gmra.mxu0 %vm2275_vm3, %v4147_v15  ;;  %v4052_v19 = vpop.f32.mrf.mxu1  ;;  %5681 = vmatpush3.bf16.msra.mxu1 %v4293_v14  ;;  %v5193_v18 = vld [vmem:[%s1460_s6] ss:$0 sm:$0xff]  ;;  %s7039_s6 = sld [smem:[#allocation41_spill]] }
 0x9f8   : > { %v4006_v20 = vpop.f32.mrf.mxu0  ;;  %5675 = vmatpush3.bf16.msra.mxu0 %v4247_v17  ;;  %5676 = vmatprep.mubr.msk.bf16.mxu0 %vm6033_vm1, %v6032_v2  ;;  %v5865_v17 = vld [vmem:[%s6354_s22] sm:$0xff]  }
 0x9f9   : > { %v5649_v21 = vpop.f32.mrf.mxu1  ;;  %5682 = vmatprep.mubr.msk.bf16.mxu1 %vm6033_vm1, %v6032_v2  ;;  %5686 = vmatprep.subr.bf16.mxu0 %v6032_v2 }
 0x9fa   : > { %v5643_v22 = vpop.f32.mrf.mxu0  ;;  %5694 = vmatprep.subr.bf16.mxu1 %v6032_v2 }
 0x9fb   : > { %v4141_v23 = vpop.f32.mrf.mxu1 }
 0x9fc   : > { %v4095_v24 = vpop.f32.mrf.mxu0  ;;  %v4150_v25 = vpack.c.bf16 %v4141_v23, %v4141_v23 }
 0x9fd   : > { %v4149_v26 = vpack.c.bf16 %v4095_v24, %v4095_v24  ;;  %v5660_v27 = vpop.f32.mrf.mxu1  ;;  %p5205_p1 = scmp.ne.s32.totalorder %s7039_s6, 1 }
 0x9fe   : > { %v5654_v28 = vpop.f32.mrf.mxu0  ;;  %5683 = vmatmul.mubr.msk.bf16.vlgmr.msra.gmra.mxu1 %vm2275_vm3, %v4150_v25 }
 0x9ff   : > { %5677 = vmatmul.mubr.msk.bf16.vlgmr.msra.gmra.mxu0 %vm2275_vm3, %v4149_v26  ;;  %v4144_v29 = vpop.f32.mrf.mxu1  ;;  %5702 = vmatprep.mubr.msk.bf16.mxu1 %vm6033_vm1, %v6032_v2  ;;  %v5197_v26 = vld [vmem:[%s1468_s11] ss:$0 sm:$0xff]  ;;  %s7041_s11 = sld [smem:[#allocation36_spill]] (!%p5205_p1) }
 0xa00   : > { %v4098_v30 = vpop.f32.mrf.mxu0  ;;  %5690 = vmatprep.mubr.msk.bf16.mxu0 %vm6033_vm1, %v6032_v2  ;;  %5687 = vmatpush3.bf16.msra.mxu0 %v5860_v1 }
 0xa01   : > { %v5661_v31 = vpop.f32.mrf.mxu1  ;;  %5688 = vmatprep.subr.bf16.mxu0 %v6032_v2 }
 0xa02   : > { %v5655_v32 = vpop.f32.mrf.mxu0 }
 0xa04   : > { %5689 = vmatpush3.bf16.msra.mxu0 %v5861_v3 }
 0xab6   : > { %v4237_v33 = vpop.f32.mrf.mxu1 }
 0xab7   : > { %v4191_v34 = vpop.f32.mrf.mxu0  ;;  %v4336_v41 = vsel %vm1603_vm2, %v4237_v33, 0.0 }
 0xab8   : > { %v5672_v35 = vpop.f32.mrf.mxu1  ;;  %v4335_v39 = vsel %vm1603_vm2, %v4191_v34, 0.0 }
 0xab9   : > { %v5666_v36 = vpop.f32.mrf.mxu0  ;;  %v4337_v46 = vadd.f32 %v4336_v41, %v4335_v39 }
 0xaba   : > { %v4240_v37 = vpop.f32.mrf.mxu1 }
 0xabb   : > { %v4194_v38 = vpop.f32.mrf.mxu0 }
 0xabc   : > { %v5673_v42 = vpop.f32.mrf.mxu1 }
 0xabd   : > { %v5667_v43 = vpop.f32.mrf.mxu0 }
 0xabe   : > { %v4329_v44 = vpop.f32.mrf.mxu1  ;;  %v5203_v43 = vld [vmem:[%s1483_s10] ss:$0 sm:$0xff] }
 0xabf   : > { %v4283_v47 = vpop.f32.mrf.mxu0  ;;  %v4340_v40 = vsel %vm1603_vm2, %v4329_v44, 0.0 }
 0xac0   : > { %v4338_v48 = vsel %vm1603_vm2, %v4283_v47, 0.0  ;;  %v5684_v49 = vpop.f32.mrf.mxu1 }
 0xac1   : > { %v4339_v50 = vadd.f32 %v4338_v48, %v4337_v46  ;;  %v5678_v53 = vpop.f32.mrf.mxu0  ;;  %v5204_v46 = vld [vmem:[%s1486_s24] ss:$0 sm:$0xff] }
 0xac2   : > { %v4332_v56 = vpop.f32.mrf.mxu1 }
 0xac3   : > { %v4341_v57 = vadd.f32 %v4340_v40, %v4339_v50  ;;  %v4286_v45 = vpop.f32.mrf.mxu0 }
 0xac4   : > { %v5685_v58 = vpop.f32.mrf.mxu1 }
 0xac5   : > { %v4348_v59 = vadd.f32 %v5190_v55, %v4341_v57  ;;  %v5679_v60 = vpop.f32.mrf.mxu0 }
 0xac7   : > { %v4349_v61 = vadd.f32 %v4348_v59, %v6609_v10  ;;  %v5862_v10 = vld [vmem:[%s6354_s22 + $0x18] sm:$0xff]   ;;  %s7040_s22 = sld [smem:[#allocation35_spill]] (!%p5205_p1) }
 0xac8   : > { %5695 = vmatpush3.bf16.msra.mxu1 %v5862_v10 }
 0xac9   : > { %v4352_v62 = vsel %vm1603_vm2, %v4349_v61, 0.0  ;;  %5696 = vmatprep.subr.bf16.mxu1 %v6032_v2 }
 0xaca   : > { %4353 = vadd.xlane.f32.xlu0 %v4352_v62 }
 0xacc   : > { %5697 = vmatpush3.bf16.msra.mxu1 %v5863_v4 }
 0xacd   : > { %5698 = vmatprep.subr.bf16.mxu1 %v6032_v2 }
 0xad0   : > { %5699 = vmatpush3.bf16.msra.mxu1 %v5864_v16 }
 0xad1   : > { %5700 = vmatprep.subr.bf16.mxu1 %v6032_v2 }
 0xad4   : > { %5701 = vmatpush3.bf16.msra.mxu1 %v5865_v17 }
 0xb53   : > { %v4354_v63 = vpop.xlane.xlu0 %4353 }
 0xb54   : > { %v4355_v52 = vmul.f32 0.03125, %v4354_v63 }
 0xb56   : > { %v4356_v54 = vsub.f32 %v4349_v61, %v4355_v52 }
 0xb58   : > { %v4357_v6 = vmul.f32 %v4356_v54, %v4356_v54 }
 0xb5a   : > { %v4358_v0 = vsel %vm1603_vm2, %v4357_v6, 0.0 }
 0xb5b   : > { %4359 = vadd.xlane.f32.xlu1 %v4358_v0 }
 0xbe4   : > { %v4360_v5 = vpop.xlane.xlu1 %4359 }
 0xbe5   : > { %v4361_v51 = vmul.f32 0.03125, %v4360_v5 }
 0xbe7   : > { %v4362_v7 = vadd.f32 1e-05, %v4361_v51 }
 0xbe9   : > { %5900 = vrsqrt.f32 %v4362_v7 }
 0xbf6   : > { %v5901_v8 = vpop.eup %5900 }
 0xbf7   : > { %v4364_v11 = vmul.f32 %v5901_v8, %v4356_v54 }
 0xbf9   : > { %v4371_v13 = vmul.f32 %v5191_v9, %v4364_v11 }
 0xbfb   : > { %v4378_v14 = vadd.f32 %v5192_v12, %v4371_v13 }
 0xbfd   : > { %v4393_v15 = vpack.c.bf16 %v4378_v14, %v4378_v14 }
 0xbff   : > { %5691 = vmatmul.mubr.msk.bf16.vlgmr.msra.gmra.mxu0 %vm1603_vm2, %v4393_v15 }
 0xcbf   : > { %v4449_v19 = vpop.f32.mrf.mxu0 }
 0xcc0   : > { %v4450_v20 = vadd.f32 %v5193_v18, %v4449_v19 }
 0xcc1   : > { %v5692_v21 = vpop.f32.mrf.mxu0 }
 0xcc2   : > { %v4455_v22 = vmax.f32 %v4450_v20, 0.0 }
 0xcc3   : > { %v4452_v23 = vpop.f32.mrf.mxu0 }
 0xcc4   : > { %v4456_v24 = vpack.c.bf16 %v4455_v22, %v4455_v22 }
 0xcc5   : > { %v5693_v25 = vpop.f32.mrf.mxu0 }
 0xcc6   : > { %5703 = vmatmul.mubr.msk.bf16.vlgmr.msra.gmra.mxu1 %vm4487_vm9, %v4456_v24 }
 0xd86   : > { %v4525_v27 = vpop.f32.mrf.mxu1 }
 0xd87   : > { %v4526_v28 = vadd.f32 %v5197_v26, %v4525_v27 }
 0xd88   : > { %v5704_v29 = vpop.f32.mrf.mxu1 }
 0xd89   : > { %v4531_v30 = vadd.f32 %v4526_v28, %v4378_v14 }
 0xd8a   : > { %v4528_v2 = vpop.f32.mrf.mxu1 }
 0xd8b   : > { %v4534_v31 = vsel %vm1603_vm2, %v4531_v30, 0.0 }
 0xd8c   : > { %4535 = vadd.xlane.f32.xlu0 %v4534_v31  ;;  %v5705_v32 = vpop.f32.mrf.mxu1 }
 0xe15   : > { %v4536_v33 = vpop.xlane.xlu0 %4535 }
 0xe16   : > { %v4537_v34 = vmul.f32 0.03125, %v4536_v33 }
 0xe18   : > { %v4538_v35 = vsub.f32 %v4531_v30, %v4537_v34 }
 0xe1a   : > { %v4539_v36 = vmul.f32 %v4538_v35, %v4538_v35 }
 0xe1c   : > { %v4540_v37 = vsel %vm1603_vm2, %v4539_v36, 0.0 }
 0xe1d   : > { %4541 = vadd.xlane.f32.xlu1 %v4540_v37 }
 0xea6   : > { %v4542_v38 = vpop.xlane.xlu1 %4541 }
 0xea7   : > { %v4543_v39 = vmul.f32 0.03125, %v4542_v38 }
 0xea9   : > { %v4544_v41 = vadd.f32 1e-05, %v4543_v39 }
 0xeab   : > { %5902 = vrsqrt.f32 %v4544_v41 }
 0xeb8   : > { %v5903_v42 = vpop.eup %5902 }
 0xeb9   : > { %v4546_v44 = vmul.f32 %v5903_v42, %v4538_v35 }
 0xebb   : > { %v4553_v47 = vmul.f32 %v5203_v43, %v4546_v44  ;;  %4565 = sbr.rel (%p5205_p1) target bundleno = 4085 (0xff5), region = 156 }
 0xebd   : > { %v4560_v48 = vadd.f32 %v5204_v46, %v4553_v47 }
 0xebf   : > { %4561 = vst.msk [vmem:[#allocation2] sm:$0xff] %vm1603_vm2, %v4560_v48 }
 0xec0   : > { %v4568_v49 = vsel %vm1603_vm2, %v4560_v48, 0.0  ;;  %v5206_v60 = vld [vmem:[%s7040_s22] ss:$0 sm:$0xff] }
 0xec1   : > { %4569 = vadd.xlane.f32.xlu0 %v4568_v49  ;;  %v5207_v62 = vld [vmem:[%s7041_s11] ss:$0 sm:$0xff] }
 0xf4a   : > { %v4570_v50 = vpop.xlane.xlu0 %4569 }
 0xf4b   : > { %v4571_v53 = vmul.f32 0.03125, %v4570_v50 }
 0xf4d   : > { %v4572_v55 = vsub.f32 %v4560_v48, %v4571_v53 }
 0xf4f   : > { %v4573_v40 = vmul.f32 %v4572_v55, %v4572_v55 }
 0xf51   : > { %v4574_v56 = vsel %vm1603_vm2, %v4573_v40, 0.0 }
 0xf52   : > { %4575 = vadd.xlane.f32.xlu0 %v4574_v56 }
 0xfdb   : > { %v4576_v57 = vpop.xlane.xlu0 %4575 }
 0xfdc   : > { %v4577_v45 = vmul.f32 0.03125, %v4576_v57 }
 0xfde   : > { %v4578_v58 = vadd.f32 1e-05, %v4577_v45 }
 0xfe0   : > { %5904 = vrsqrt.f32 %v4578_v58 }
 0xfed   : > { %v5905_v59 = vpop.eup %5904 }
 0xfee   : > { %v4580_v61 = vmul.f32 %v5905_v59, %v4572_v55 }
 0xff0   : > { %v4587_v63 = vmul.f32 %v5206_v60, %v4580_v61 }
 0xff2   : > { %v4594_v52 = vadd.f32 %v5207_v62, %v4587_v63 }
 0xff4   : > { %4595 = vst.msk [vmem:[%s1366_s12] sm:$0xff] %vm1603_vm2, %v4594_v52 }
 0xff5 PF: > { %s7043_s24 = sld [smem:[#allocation42_spill]]  ;;  %s4610_s14 = sshll.u32 %s1366_s12, 4  ;;  %s4611_s14 = int_to_ptr.vmem [resolvable:$true] %s4610_s14 }
 0xff6   : > { %s7044_s23 = sld [smem:[#allocation37_spill]]  ;;  %s5906_s18 = scalar_lea.vmem %s4611_s14, 128 }
 0xff7   : > { %s7046_s17 = sld [smem:[#allocation39_spill]]  ;;  %p5907_p2 = scmp.ne.s32.totalorder %s4611_s14, %s5906_s18 }
 0xff8   : > { %s6035_s0 = smov [#allocation3]  }
 0xff9   : > { %p5908_p4 = pnand %p5907_p2, %p6255_p3  ;;  %s5910_s15 = sshll.u32 %s6035_s0, 4  ;;  %s5911_s15 = int_to_ptr.vmem [resolvable:$false] %s5910_s15 }
 0xffa   : > { %s5912_s20 = scalar_lea.vmem %s5911_s15, 256  ;;  %p5913_p6 = scmp.lt.s32.totalorder %s4611_s14, %s5911_s15 }
 0xffb   : > { %s5209_s25 = sshll.u32 %s7043_s24, 7  ;;  %p5909_p5 = pneg %p5908_p4 }
 0xffc   : > { %s4608_s8 = scalar_lea.hbm %s7044_s23, %s5209_s25  ;;  %p5914_p7 = scmp.lt.s32.totalorder %s5912_s20, %s5906_s18 }
 0xffd   : > { %s7048_s28 = sand.u32 1, %s7046_s17  }
 0xffe   : > { %s4597_s2 = scalar_lea.sflag [#allocation4], %s7048_s28  ;;  %p5915_p8 = por %p5914_p7, %p5913_p6 }
0x1000   : > { %p5916_p10 = pnand %p5915_p8, %p5909_p5 }
0x1002   : > { %5919 = shalt.err (!%p5916_p10)
}
0x1003   : > { %s5920_s26 = scalar_lea.hbm %s4608_s8, 128  ;;  %s5924_s12 = scalar_lea.hbm %s7044_s23, 256 }
0x1004   : > { %p5921_p11 = scmp.ne.s32.totalorder %s4608_s8, %s5920_s26  ;;  %p5925_p0 = scmp.lt.s32.totalorder %s4608_s8, %s7044_s23 }
0x1005   : > { %p5926_p1 = scmp.lt.s32.totalorder %s5924_s12, %s5920_s26 }
0x1006   : > { %p5922_p12 = pnand %p5921_p11, %p6255_p3 }
0x1007   : > { %p5927_p2 = por %p5926_p1, %p5925_p0 }
0x1008   : > { %p5923_p13 = pneg %p5922_p12 }
0x100a   : > { %p5928_p4 = pnand %p5927_p2, %p5923_p13 }
0x100c   : > { %5931 = shalt.err (!%p5928_p4)
}
0x100d   : > { %5706 = dma.vmem_to_hbm [thread:$0]  (%p6255_p3), %s4611_s14, 128, %s4608_s8, %s4597_s2  }
0x100e PF: > { %s7049_s16 = sld [smem:[#allocation45_spill]] }
0x100f   : > { %s7050_s7 = sld [smem:[#allocation38_spill]] }
0x1014   : > { %p5712_p5 = scmp.ge.s32.totalorder %s7049_s16, 2 }
0x1015   : > { %s4622_s5 = sand.u32 1, %s7050_s7  }
0x1016   : > { %p5709_p6 = pnand %p5712_p5, %p6265_p9  ;;  %s4623_s29 = scalar_lea.sflag [#allocation4], %s4622_s5 }
0x1018   : > { %p5710_p7 = pneg %p5709_p6 }
0x101a   : > { %5965 = dma.done.wait (%p5710_p7), %s4623_s29, 128  }
0x101b   : > { %5967 = vsyncadd (%p5710_p7), %s4623_s29, 4294967168  ;;  %s78_s16 = sadd.s32 1, %s7049_s16   ;;  %s7052_s28 = sld [smem:[#allocation39_spill]] }
0x101c   : > { %p75_p8 = scmp.ge.s32.totalorder %s78_s16, 6   ;;  %s7053_s1 = sld [smem:[#allocation40_spill]] }
0x101d   : > { %s7054_s2 = sld [smem:[#allocation50_spill]] }
0x101e   : > { %s7055_s7 = sld [smem:[#allocation43_spill]]  ;;  %77 = sbr.rel (!%p75_p8) target bundleno = 80 (0x50), region = 310 }
0x101f   : > { %s7056_s10 = sld [smem:[#allocation44_spill]] }
0x1020   : > { %s7057_s11 = sld [smem:[#allocation46_spill]] }
0x1021   : > { %s7058_s15 = sld [smem:[#allocation48_spill]] }
0x1023   :  { %4628 = vsyncpa [#allocation4], 1 }
0x1024   :  { %4630 = vsyncpa [#allocation4 + $0x1], 1 }

</bundles_post_ra>
